<compile_context>
chip_gen: v5e
topology: v5e:2x2
jax: 0.10.0
libtpu: 0.0.40
codegen_flags: <defaults>
</compile_context>

<pallas_src>
import numpy as np
import jax
import jax.numpy as jnp
from jax.experimental import pallas as pl
from jax.experimental.pallas import tpu as pltpu

K = 7          # conv kernel size
PAD = 3        # conv padding ("same")
BN_EPS = 1e-5


def _make_kernel(W, HW, C, bb):
    inv_c = 1.0 / float(C)
    # Flat-index offset of every (dy, dx) tap.  Rolling the lane-concatenated
    # [max | avg] slab by (-offset) mod 2*HW brings x[p + dy*W + dx] to lane p.
    # Cross-half / cross-row wraparound only lands where the boundary mask
    # (folded into the weight rows) is zero, so it is harmless.
    shifts = [(-(oy * W + ox)) % (2 * HW)
              for oy in range(-PAD, PAD + 1)
              for ox in range(-PAD, PAD + 1)]

    def kernel(shift_ref, wtap_ref, x_ref, o_ref, max_acc, sum_acc):
        # shift_ref: SMEM (1,)          BN shift (beta - mean * scale)
        # wtap_ref : VMEM (49, 2*HW)    per-tap weights (BN scale + pad mask folded)
        # x_ref    : VMEM (bb, cb, HW)  native-dtype channel chunk
        # o_ref    : VMEM (bb, 1, HW)   flat attention map
        # max_acc / sum_acc : VMEM (bb, HW) f32 running channel max / sum
        c_step = pl.program_id(1)

        @pl.when(c_step == 0)
        def _init():
            max_acc[...] = jnp.full((bb, HW), -jnp.inf, dtype=jnp.float32)
            sum_acc[...] = jnp.zeros((bb, HW), dtype=jnp.float32)

        # Streaming phase: whole-tile reduction over the channel (sublane)
        # axis.  Max in native dtype (exact); sum accumulated in f32.
        xt = x_ref[...]                                            # (bb, cb, HW)
        m = jnp.maximum(max_acc[...], jnp.max(xt, axis=1).astype(jnp.float32))
        s = sum_acc[...] + jnp.sum(xt.astype(jnp.float32), axis=1)
        max_acc[...] = m
        sum_acc[...] = s

        @pl.when(c_step == pl.num_programs(1) - 1)
        def _finalize():
            # Lane-concatenated [max | avg] slab: one roll + one FMA per tap.
            cat = jnp.concatenate([m, s * inv_c], axis=1)          # (bb, 2*HW)
            acc = jnp.zeros((bb, 2 * HW), dtype=jnp.float32)
            for t, sh in enumerate(shifts):
                rolled = pltpu.roll(cat, sh, axis=1) if sh else cat
                acc = acc + wtap_ref[t:t + 1, :] * rolled
            # Fold the max-half and avg-half contributions.
            folded = acc + pltpu.roll(acc, HW, axis=1)
            res = jax.nn.sigmoid(folded[:, :HW] + shift_ref[0])    # (bb, HW)
            o_ref[:, 0, :] = res.astype(o_ref.dtype)

    return kernel


def _vmem_limit_bytes():
    """Scoped-VMEM limit sized from the chip's physical VMEM, with headroom."""
    try:
        cap = int(pltpu.get_tpu_info().vmem_capacity_bytes)
    except Exception:
        cap = 64 * 1024 * 1024          # v7x-safe assumption
    return min(max(cap * 3 // 4, 32 * 1024 * 1024), 64 * 1024 * 1024)


def _pick_blocks(N, C, HW, itemsize, budget_bytes=8 * 1024 * 1024):
    """Pick (batch rows, channels) per grid step.

    Channel chunk cb: (8,128) rule on the x block's last-two dims -> cb must be
    a multiple of 8 or the full C.  Sized so one (1, cb, HW) slab is ~8 MiB.
    Batch rows bb: leading dim of the 3-D x / output blocks -> unconstrained.
    Keep >= 2 batch blocks whenever N >= 2 so both v7x TensorCores get work;
    on v5e/v6e this is neutral (same total bytes and grid steps).
    """
    if C <= 8 or C % 8 != 0:
        cb = C   # full-C chunk (only legal choice when C is not a multiple of 8)
    else:
        max_cb = max(8, budget_bytes // max(1, HW * itemsize))
        cands = [c for c in range(8, C + 1, 8) if C % c == 0 and c <= max_cb]
        cb = max(cands) if cands else 8   # cb=8 always divides C here (no OOM path)

    if cb == C:
        # Whole channel axis fits in one chunk: pack several batch rows per DMA,
        # but leave >= 2 batch blocks for megacore sharding.
        row_bytes = max(1, C * HW * itemsize)
        max_bb = max(1, budget_bytes // row_bytes)
        bb_cap = N if N < 2 else N // 2
        cands = [b for b in range(1, min(max_bb, bb_cap) + 1) if N % b == 0]
        bb = max(cands) if cands else 1
    else:
        bb = 1
    return bb, cb


def spatial_attention(x, conv_weight_oihw,
                      bn_gamma=1.0, bn_beta=0.0,
                      bn_mean=0.0, bn_var=1.0, bn_eps=BN_EPS):
    """x: (N, C, H, W) float dtype; conv_weight_oihw: (1, 2, 7, 7)."""
    N, C, H, W = x.shape
    HW = H * W

    # Fold eval-mode BatchNorm into the conv weights (scale) + a scalar shift.
    bn_scale = bn_gamma / jnp.sqrt(jnp.asarray(bn_var, jnp.float32) + bn_eps)
    shift = jnp.reshape(jnp.asarray(bn_beta - bn_mean * bn_scale, jnp.float32), (1,))
    w2 = conv_weight_oihw[0].reshape(2, K * K).astype(jnp.float32) * bn_scale  # (2, 49)

    # Per-tap weight rows for the lane-concatenated [max | avg] slab with the
    # zero-padding boundary mask folded in (static masks built host-side).
    # Footprint: 49 * 2*HW * 4 bytes of VMEM (fine up to ~128x128 maps).
    # TODO(synk): tile the finalize spatially for very large H*W feature maps.
    idx = np.arange(HW)
    xi, yi = idx % W, idx // W
    valid = np.stack([((yi + oy >= 0) & (yi + oy < H) &
                       (xi + ox >= 0) & (xi + ox < W))
                      for oy in range(-PAD, PAD + 1)
                      for ox in range(-PAD, PAD + 1)]).astype(np.float32)      # (49, HW)
    valid = jnp.asarray(valid)
    wtap = jnp.concatenate([w2[0][:, None] * valid,
                            w2[1][:, None] * valid], axis=1)                   # (49, 2*HW)

    bb, cb = _pick_blocks(N, C, HW, x.dtype.itemsize)
    x_flat = x.reshape(N, C, HW)          # free metadata reshape; native dtype

    kernel = _make_kernel(W, HW, C, bb)
    out_flat = pl.pallas_call(
        kernel,
        out_shape=jax.ShapeDtypeStruct((N, 1, HW), x.dtype),
        grid=(N // bb, C // cb),
        in_specs=[
            pl.BlockSpec(memory_space=pltpu.MemorySpace.SMEM),        # BN shift
            pl.BlockSpec((K * K, 2 * HW), lambda b, c: (0, 0)),       # tap weights
            pl.BlockSpec((bb, cb, HW), lambda b, c: (b, c, 0)),       # x chunk
        ],
        out_specs=pl.BlockSpec((bb, 1, HW), lambda b, c: (b, 0, 0)),
        scratch_shapes=[
            pltpu.VMEM((bb, HW), jnp.float32),     # running channel max
            pltpu.VMEM((bb, HW), jnp.float32),     # running channel sum
        ],
        compiler_params=pltpu.CompilerParams(
            dimension_semantics=("parallel", "arbitrary"),
            vmem_limit_bytes=_vmem_limit_bytes()),
        cost_estimate=pl.CostEstimate(
            flops=2 * N * C * HW + 4 * K * K * N * HW,
            transcendentals=N * HW,
            bytes_accessed=(N * C * HW + N * HW) * x.dtype.itemsize
                           + (K * K * 2 * HW + 1) * 4),
    )(shift, wtap, x_flat)

    return out_flat.reshape(N, 1, H, W)


def spatial_attention_reference(x, conv_weight_oihw, bn_eps=BN_EPS):
    """Pure-JAX reference mirroring the PyTorch forward (BN in eval mode)."""
    max_out = jnp.max(x, axis=1, keepdims=True)
    avg_out = jnp.mean(x, axis=1, keepdims=True)
    cat = jnp.concatenate([max_out, avg_out], axis=1)                # (N, 2, H, W)
    conv = jax.lax.conv_general_dilated(
        cat, conv_weight_oihw, window_strides=(1, 1),
        padding=((PAD, PAD), (PAD, PAD)),
        dimension_numbers=('NCHW', 'OIHW', 'NCHW'))
    bn = conv / jnp.sqrt(1.0 + bn_eps)                               # gamma=1, beta=0
    return jax.nn.sigmoid(bn)


if __name__ == "__main__":
    key = jax.random.PRNGKey(0)
    kx, kw = jax.random.split(key)

    N, C, H, W = 2, 4, 16, 16
    x = jax.random.normal(kx, (N, C, H, W), dtype=jnp.float32)

    # Conv2d(2, 1, 7, bias=False) -> OIHW (1, 2, 7, 7) weight.
    fan_in = 2 * K * K
    bound = 1.0 / jnp.sqrt(fan_in)
    conv_weight = jax.random.uniform(
        kw, (1, 2, K, K), dtype=jnp.float32, minval=-bound, maxval=bound)

    out = spatial_attention(x, conv_weight)
    out = jax.block_until_ready(out)

    ref = spatial_attention_reference(x, conv_weight)
    assert out.shape == (N, 1, H, W)
    assert jnp.allclose(out, ref, rtol=1e-5, atol=1e-5), (
        f"max abs err = {jnp.max(jnp.abs(out - ref))}")

    print("KERNEL_OK")
</pallas_src>

<mosaic_0001>
module attributes {stable_mosaic.version = 11 : i64} {
  func.func @kernel(%arg0: i32, %arg1: i32, %arg2: memref<1xf32, #tpu.memory_space<smem>>, %arg3: memref<49x512xf32, #tpu.memory_space<vmem>>, %arg4: memref<1x4x256xf32, #tpu.memory_space<vmem>>, %arg5: memref<1x1x256xf32, #tpu.memory_space<vmem>>, %arg6: memref<1x256xf32, #tpu.memory_space<vmem>>, %arg7: memref<1x256xf32, #tpu.memory_space<vmem>>) attributes {dimension_semantics = [#tpu.dimension_semantics<parallel>, #tpu.dimension_semantics<arbitrary>], iteration_bounds = array<i64: 2, 1>, scalar_prefetch = 0 : i64, scratch_operands = 2 : i64, tpu.core_type = #tpu.core_type<tc>, window_params = [{transform_indices = @transform_0, window_bounds = array<i64: 1>}, {pipeline_mode = #tpu.pipeline_mode<synchronous>, transform_indices = @transform_1, window_bounds = array<i64: 49, 512>}, {transform_indices = @transform_2, window_bounds = array<i64: 1, 4, 256>}, {transform_indices = @transform_3, window_bounds = array<i64: 1, 1, 256>}]} {
    %c0_i32 = arith.constant 0 : i32
    %0 = arith.cmpi eq, %arg1, %c0_i32 : i32
    %1 = arith.extui %0 : i1 to i32
    %c0_i32_0 = arith.constant 0 : i32
    %2 = arith.cmpi ne, %1, %c0_i32_0 : i32
    scf.if %2 {
      %cst_14 = arith.constant 0xFF800000 : f32
      %15 = vector.broadcast %cst_14 : f32 to vector<1x256xf32>
      %c0_15 = arith.constant 0 : index
      %c0_16 = arith.constant 0 : index
      %16 = vector.load %arg6[%c0_15, %c0_16] : memref<1x256xf32, #tpu.memory_space<vmem>>, vector<1x256xf32>
      tpu.vector_store %arg6[%c0_15, %c0_16], %15 {strides = array<i32>} : memref<1x256xf32, #tpu.memory_space<vmem>>, vector<1x256xf32>,
      %cst_17 = arith.constant 0.000000e+00 : f32
      %17 = vector.broadcast %cst_17 : f32 to vector<1x256xf32>
      %c0_18 = arith.constant 0 : index
      %c0_19 = arith.constant 0 : index
      %18 = vector.load %arg7[%c0_18, %c0_19] : memref<1x256xf32, #tpu.memory_space<vmem>>, vector<1x256xf32>
      tpu.vector_store %arg7[%c0_18, %c0_19], %17 {strides = array<i32>} : memref<1x256xf32, #tpu.memory_space<vmem>>, vector<1x256xf32>,
    } else {
    }
    %c0 = arith.constant 0 : index
    %c0_1 = arith.constant 0 : index
    %c0_2 = arith.constant 0 : index
    %3 = vector.load %arg4[%c0, %c0_1, %c0_2] : memref<1x4x256xf32, #tpu.memory_space<vmem>>, vector<1x4x256xf32>
    %c0_3 = arith.constant 0 : index
    %c0_4 = arith.constant 0 : index
    %4 = vector.load %arg6[%c0_3, %c0_4] : memref<1x256xf32, #tpu.memory_space<vmem>>, vector<1x256xf32>
    %cst = arith.constant dense<0xFF800000> : vector<1x256xf32>
    %5 = vector.multi_reduction <maximumf>, %3, %cst [1] : vector<1x4x256xf32> to vector<1x256xf32>
    %6 = arith.maximumf %4, %5 : vector<1x256xf32>
    %c0_5 = arith.constant 0 : index
    %c0_6 = arith.constant 0 : index
    %7 = vector.load %arg7[%c0_5, %c0_6] : memref<1x256xf32, #tpu.memory_space<vmem>>, vector<1x256xf32>
    %cst_7 = arith.constant dense<0.000000e+00> : vector<1x256xf32>
    %8 = vector.multi_reduction <add>, %3, %cst_7 [1] : vector<1x4x256xf32> to vector<1x256xf32>
    %9 = arith.addf %7, %8 : vector<1x256xf32>
    %c0_8 = arith.constant 0 : index
    %c0_9 = arith.constant 0 : index
    %10 = vector.load %arg6[%c0_8, %c0_9] : memref<1x256xf32, #tpu.memory_space<vmem>>, vector<1x256xf32>
    tpu.vector_store %arg6[%c0_8, %c0_9], %6 {strides = array<i32>} : memref<1x256xf32, #tpu.memory_space<vmem>>, vector<1x256xf32>,
    %c0_10 = arith.constant 0 : index
    %c0_11 = arith.constant 0 : index
    %11 = vector.load %arg7[%c0_10, %c0_11] : memref<1x256xf32, #tpu.memory_space<vmem>>, vector<1x256xf32>
    tpu.vector_store %arg7[%c0_10, %c0_11], %9 {strides = array<i32>} : memref<1x256xf32, #tpu.memory_space<vmem>>, vector<1x256xf32>,
    %c0_i32_12 = arith.constant 0 : i32
    %12 = arith.cmpi eq, %arg1, %c0_i32_12 : i32
    %13 = arith.extui %12 : i1 to i32
    %c0_i32_13 = arith.constant 0 : i32
    %14 = arith.cmpi ne, %13, %c0_i32_13 : i32
    scf.if %14 {
      %cst_14 = arith.constant 2.500000e-01 : f32
      %15 = vector.broadcast %cst_14 : f32 to vector<1x256xf32>
      %16 = arith.mulf %9, %15 : vector<1x256xf32>
      %17 = tpu.concatenate %6, %16 in 1 : vector<1x256xf32>, vector<1x256xf32> -> vector<1x512xf32>
      %cst_15 = arith.constant 0.000000e+00 : f32
      %18 = vector.broadcast %cst_15 : f32 to vector<1x512xf32>
      %c51_i32 = arith.constant 51 : i32
      %19 = tpu.dynamic_rotate %17 by %c51_i32 dim 1 : vector<1x512xf32>, i32 -> vector<1x512xf32>
      %c0_16 = arith.constant 0 : index
      %c0_17 = arith.constant 0 : index
      %20 = vector.load %arg3[%c0_16, %c0_17] : memref<49x512xf32, #tpu.memory_space<vmem>>, vector<1x512xf32>
      %21 = arith.mulf %20, %19 : vector<1x512xf32>
      %22 = arith.addf %18, %21 : vector<1x512xf32>
      %c50_i32 = arith.constant 50 : i32
      %23 = tpu.dynamic_rotate %17 by %c50_i32 dim 1 : vector<1x512xf32>, i32 -> vector<1x512xf32>
      %c1 = arith.constant 1 : index
      %c0_18 = arith.constant 0 : index
      %24 = vector.load %arg3[%c1, %c0_18] : memref<49x512xf32, #tpu.memory_space<vmem>>, vector<1x512xf32>
      %25 = arith.mulf %24, %23 : vector<1x512xf32>
      %26 = arith.addf %22, %25 : vector<1x512xf32>
      %c49_i32 = arith.constant 49 : i32
      %27 = tpu.dynamic_rotate %17 by %c49_i32 dim 1 : vector<1x512xf32>, i32 -> vector<1x512xf32>
      %c2 = arith.constant 2 : index
      %c0_19 = arith.constant 0 : index
      %28 = vector.load %arg3[%c2, %c0_19] : memref<49x512xf32, #tpu.memory_space<vmem>>, vector<1x512xf32>
      %29 = arith.mulf %28, %27 : vector<1x512xf32>
      %30 = arith.addf %26, %29 : vector<1x512xf32>
      %c48_i32 = arith.constant 48 : i32
      %31 = tpu.dynamic_rotate %17 by %c48_i32 dim 1 : vector<1x512xf32>, i32 -> vector<1x512xf32>
      %c3 = arith.constant 3 : index
      %c0_20 = arith.constant 0 : index
      %32 = vector.load %arg3[%c3, %c0_20] : memref<49x512xf32, #tpu.memory_space<vmem>>, vector<1x512xf32>
      %33 = arith.mulf %32, %31 : vector<1x512xf32>
      %34 = arith.addf %30, %33 : vector<1x512xf32>
      %c47_i32 = arith.constant 47 : i32
      %35 = tpu.dynamic_rotate %17 by %c47_i32 dim 1 : vector<1x512xf32>, i32 -> vector<1x512xf32>
      %c4 = arith.constant 4 : index
      %c0_21 = arith.constant 0 : index
      %36 = vector.load %arg3[%c4, %c0_21] : memref<49x512xf32, #tpu.memory_space<vmem>>, vector<1x512xf32>
      %37 = arith.mulf %36, %35 : vector<1x512xf32>
      %38 = arith.addf %34, %37 : vector<1x512xf32>
      %c46_i32 = arith.constant 46 : i32
      %39 = tpu.dynamic_rotate %17 by %c46_i32 dim 1 : vector<1x512xf32>, i32 -> vector<1x512xf32>
      %c5 = arith.constant 5 : index
      %c0_22 = arith.constant 0 : index
      %40 = vector.load %arg3[%c5, %c0_22] : memref<49x512xf32, #tpu.memory_space<vmem>>, vector<1x512xf32>
      %41 = arith.mulf %40, %39 : vector<1x512xf32>
      %42 = arith.addf %38, %41 : vector<1x512xf32>
      %c45_i32 = arith.constant 45 : i32
      %43 = tpu.dynamic_rotate %17 by %c45_i32 dim 1 : vector<1x512xf32>, i32 -> vector<1x512xf32>
      %c6 = arith.constant 6 : index
      %c0_23 = arith.constant 0 : index
      %44 = vector.load %arg3[%c6, %c0_23] : memref<49x512xf32, #tpu.memory_space<vmem>>, vector<1x512xf32>
      %45 = arith.mulf %44, %43 : vector<1x512xf32>
      %46 = arith.addf %42, %45 : vector<1x512xf32>
      %c35_i32 = arith.constant 35 : i32
      %47 = tpu.dynamic_rotate %17 by %c35_i32 dim 1 : vector<1x512xf32>, i32 -> vector<1x512xf32>
      %c7 = arith.constant 7 : index
      %c0_24 = arith.constant 0 : index
      %48 = vector.load %arg3[%c7, %c0_24] : memref<49x512xf32, #tpu.memory_space<vmem>>, vector<1x512xf32>
      %49 = arith.mulf %48, %47 : vector<1x512xf32>
      %50 = arith.addf %46, %49 : vector<1x512xf32>
      %c34_i32 = arith.constant 34 : i32
      %51 = tpu.dynamic_rotate %17 by %c34_i32 dim 1 : vector<1x512xf32>, i32 -> vector<1x512xf32>
      %c8 = arith.constant 8 : index
      %c0_25 = arith.constant 0 : index
      %52 = vector.load %arg3[%c8, %c0_25] : memref<49x512xf32, #tpu.memory_space<vmem>>, vector<1x512xf32>
      %53 = arith.mulf %52, %51 : vector<1x512xf32>
      %54 = arith.addf %50, %53 : vector<1x512xf32>
      %c33_i32 = arith.constant 33 : i32
      %55 = tpu.dynamic_rotate %17 by %c33_i32 dim 1 : vector<1x512xf32>, i32 -> vector<1x512xf32>
      %c9 = arith.constant 9 : index
      %c0_26 = arith.constant 0 : index
      %56 = vector.load %arg3[%c9, %c0_26] : memref<49x512xf32, #tpu.memory_space<vmem>>, vector<1x512xf32>
      %57 = arith.mulf %56, %55 : vector<1x512xf32>
      %58 = arith.addf %54, %57 : vector<1x512xf32>
      %c32_i32 = arith.constant 32 : i32
      %59 = tpu.dynamic_rotate %17 by %c32_i32 dim 1 : vector<1x512xf32>, i32 -> vector<1x512xf32>
      %c10 = arith.constant 10 : index
      %c0_27 = arith.constant 0 : index
      %60 = vector.load %arg3[%c10, %c0_27] : memref<49x512xf32, #tpu.memory_space<vmem>>, vector<1x512xf32>
      %61 = arith.mulf %60, %59 : vector<1x512xf32>
      %62 = arith.addf %58, %61 : vector<1x512xf32>
      %c31_i32 = arith.constant 31 : i32
      %63 = tpu.dynamic_rotate %17 by %c31_i32 dim 1 : vector<1x512xf32>, i32 -> vector<1x512xf32>
      %c11 = arith.constant 11 : index
      %c0_28 = arith.constant 0 : index
      %64 = vector.load %arg3[%c11, %c0_28] : memref<49x512xf32, #tpu.memory_space<vmem>>, vector<1x512xf32>
      %65 = arith.mulf %64, %63 : vector<1x512xf32>
      %66 = arith.addf %62, %65 : vector<1x512xf32>
      %c30_i32 = arith.constant 30 : i32
      %67 = tpu.dynamic_rotate %17 by %c30_i32 dim 1 : vector<1x512xf32>, i32 -> vector<1x512xf32>
      %c12 = arith.constant 12 : index
      %c0_29 = arith.constant 0 : index
      %68 = vector.load %arg3[%c12, %c0_29] : memref<49x512xf32, #tpu.memory_space<vmem>>, vector<1x512xf32>
      %69 = arith.mulf %68, %67 : vector<1x512xf32>
      %70 = arith.addf %66, %69 : vector<1x512xf32>
      %c29_i32 = arith.constant 29 : i32
      %71 = tpu.dynamic_rotate %17 by %c29_i32 dim 1 : vector<1x512xf32>, i32 -> vector<1x512xf32>
      %c13 = arith.constant 13 : index
      %c0_30 = arith.constant 0 : index
      %72 = vector.load %arg3[%c13, %c0_30] : memref<49x512xf32, #tpu.memory_space<vmem>>, vector<1x512xf32>
      %73 = arith.mulf %72, %71 : vector<1x512xf32>
      %74 = arith.addf %70, %73 : vector<1x512xf32>
      %c19_i32 = arith.constant 19 : i32
      %75 = tpu.dynamic_rotate %17 by %c19_i32 dim 1 : vector<1x512xf32>, i32 -> vector<1x512xf32>
      %c14 = arith.constant 14 : index
      %c0_31 = arith.constant 0 : index
      %76 = vector.load %arg3[%c14, %c0_31] : memref<49x512xf32, #tpu.memory_space<vmem>>, vector<1x512xf32>
      %77 = arith.mulf %76, %75 : vector<1x512xf32>
      %78 = arith.addf %74, %77 : vector<1x512xf32>
      %c18_i32 = arith.constant 18 : i32
      %79 = tpu.dynamic_rotate %17 by %c18_i32 dim 1 : vector<1x512xf32>, i32 -> vector<1x512xf32>
      %c15 = arith.constant 15 : index
      %c0_32 = arith.constant 0 : index
      %80 = vector.load %arg3[%c15, %c0_32] : memref<49x512xf32, #tpu.memory_space<vmem>>, vector<1x512xf32>
      %81 = arith.mulf %80, %79 : vector<1x512xf32>
      %82 = arith.addf %78, %81 : vector<1x512xf32>
      %c17_i32 = arith.constant 17 : i32
      %83 = tpu.dynamic_rotate %17 by %c17_i32 dim 1 : vector<1x512xf32>, i32 -> vector<1x512xf32>
      %c16 = arith.constant 16 : index
      %c0_33 = arith.constant 0 : index
      %84 = vector.load %arg3[%c16, %c0_33] : memref<49x512xf32, #tpu.memory_space<vmem>>, vector<1x512xf32>
      %85 = arith.mulf %84, %83 : vector<1x512xf32>
      %86 = arith.addf %82, %85 : vector<1x512xf32>
      %c16_i32 = arith.constant 16 : i32
      %87 = tpu.dynamic_rotate %17 by %c16_i32 dim 1 : vector<1x512xf32>, i32 -> vector<1x512xf32>
      %c17 = arith.constant 17 : index
      %c0_34 = arith.constant 0 : index
      %88 = vector.load %arg3[%c17, %c0_34] : memref<49x512xf32, #tpu.memory_space<vmem>>, vector<1x512xf32>
      %89 = arith.mulf %88, %87 : vector<1x512xf32>
      %90 = arith.addf %86, %89 : vector<1x512xf32>
      %c15_i32 = arith.constant 15 : i32
      %91 = tpu.dynamic_rotate %17 by %c15_i32 dim 1 : vector<1x512xf32>, i32 -> vector<1x512xf32>
      %c18 = arith.constant 18 : index
      %c0_35 = arith.constant 0 : index
      %92 = vector.load %arg3[%c18, %c0_35] : memref<49x512xf32, #tpu.memory_space<vmem>>, vector<1x512xf32>
      %93 = arith.mulf %92, %91 : vector<1x512xf32>
      %94 = arith.addf %90, %93 : vector<1x512xf32>
      %c14_i32 = arith.constant 14 : i32
      %95 = tpu.dynamic_rotate %17 by %c14_i32 dim 1 : vector<1x512xf32>, i32 -> vector<1x512xf32>
      %c19 = arith.constant 19 : index
      %c0_36 = arith.constant 0 : index
      %96 = vector.load %arg3[%c19, %c0_36] : memref<49x512xf32, #tpu.memory_space<vmem>>, vector<1x512xf32>
      %97 = arith.mulf %96, %95 : vector<1x512xf32>
      %98 = arith.addf %94, %97 : vector<1x512xf32>
      %c13_i32 = arith.constant 13 : i32
      %99 = tpu.dynamic_rotate %17 by %c13_i32 dim 1 : vector<1x512xf32>, i32 -> vector<1x512xf32>
      %c20 = arith.constant 20 : index
      %c0_37 = arith.constant 0 : index
      %100 = vector.load %arg3[%c20, %c0_37] : memref<49x512xf32, #tpu.memory_space<vmem>>, vector<1x512xf32>
      %101 = arith.mulf %100, %99 : vector<1x512xf32>
      %102 = arith.addf %98, %101 : vector<1x512xf32>
      %c3_i32 = arith.constant 3 : i32
      %103 = tpu.dynamic_rotate %17 by %c3_i32 dim 1 : vector<1x512xf32>, i32 -> vector<1x512xf32>
      %c21 = arith.constant 21 : index
      %c0_38 = arith.constant 0 : index
      %104 = vector.load %arg3[%c21, %c0_38] : memref<49x512xf32, #tpu.memory_space<vmem>>, vector<1x512xf32>
      %105 = arith.mulf %104, %103 : vector<1x512xf32>
      %106 = arith.addf %102, %105 : vector<1x512xf32>
      %c2_i32 = arith.constant 2 : i32
      %107 = tpu.dynamic_rotate %17 by %c2_i32 dim 1 : vector<1x512xf32>, i32 -> vector<1x512xf32>
      %c22 = arith.constant 22 : index
      %c0_39 = arith.constant 0 : index
      %108 = vector.load %arg3[%c22, %c0_39] : memref<49x512xf32, #tpu.memory_space<vmem>>, vector<1x512xf32>
      %109 = arith.mulf %108, %107 : vector<1x512xf32>
      %110 = arith.addf %106, %109 : vector<1x512xf32>
      %c1_i32 = arith.constant 1 : i32
      %111 = tpu.dynamic_rotate %17 by %c1_i32 dim 1 : vector<1x512xf32>, i32 -> vector<1x512xf32>
      %c23 = arith.constant 23 : index
      %c0_40 = arith.constant 0 : index
      %112 = vector.load %arg3[%c23, %c0_40] : memref<49x512xf32, #tpu.memory_space<vmem>>, vector<1x512xf32>
      %113 = arith.mulf %112, %111 : vector<1x512xf32>
      %114 = arith.addf %110, %113 : vector<1x512xf32>
      %c24 = arith.constant 24 : index
      %c0_41 = arith.constant 0 : index
      %115 = vector.load %arg3[%c24, %c0_41] : memref<49x512xf32, #tpu.memory_space<vmem>>, vector<1x512xf32>
      %116 = arith.mulf %115, %17 : vector<1x512xf32>
      %117 = arith.addf %114, %116 : vector<1x512xf32>
      %c511_i32 = arith.constant 511 : i32
      %118 = tpu.dynamic_rotate %17 by %c511_i32 dim 1 : vector<1x512xf32>, i32 -> vector<1x512xf32>
      %c25 = arith.constant 25 : index
      %c0_42 = arith.constant 0 : index
      %119 = vector.load %arg3[%c25, %c0_42] : memref<49x512xf32, #tpu.memory_space<vmem>>, vector<1x512xf32>
      %120 = arith.mulf %119, %118 : vector<1x512xf32>
      %121 = arith.addf %117, %120 : vector<1x512xf32>
      %c510_i32 = arith.constant 510 : i32
      %122 = tpu.dynamic_rotate %17 by %c510_i32 dim 1 : vector<1x512xf32>, i32 -> vector<1x512xf32>
      %c26 = arith.constant 26 : index
      %c0_43 = arith.constant 0 : index
      %123 = vector.load %arg3[%c26, %c0_43] : memref<49x512xf32, #tpu.memory_space<vmem>>, vector<1x512xf32>
      %124 = arith.mulf %123, %122 : vector<1x512xf32>
      %125 = arith.addf %121, %124 : vector<1x512xf32>
      %c509_i32 = arith.constant 509 : i32
      %126 = tpu.dynamic_rotate %17 by %c509_i32 dim 1 : vector<1x512xf32>, i32 -> vector<1x512xf32>
      %c27 = arith.constant 27 : index
      %c0_44 = arith.constant 0 : index
      %127 = vector.load %arg3[%c27, %c0_44] : memref<49x512xf32, #tpu.memory_space<vmem>>, vector<1x512xf32>
      %128 = arith.mulf %127, %126 : vector<1x512xf32>
      %129 = arith.addf %125, %128 : vector<1x512xf32>
      %c499_i32 = arith.constant 499 : i32
      %130 = tpu.dynamic_rotate %17 by %c499_i32 dim 1 : vector<1x512xf32>, i32 -> vector<1x512xf32>
      %c28 = arith.constant 28 : index
      %c0_45 = arith.constant 0 : index
      %131 = vector.load %arg3[%c28, %c0_45] : memref<49x512xf32, #tpu.memory_space<vmem>>, vector<1x512xf32>
      %132 = arith.mulf %131, %130 : vector<1x512xf32>
      %133 = arith.addf %129, %132 : vector<1x512xf32>
      %c498_i32 = arith.constant 498 : i32
      %134 = tpu.dynamic_rotate %17 by %c498_i32 dim 1 : vector<1x512xf32>, i32 -> vector<1x512xf32>
      %c29 = arith.constant 29 : index
      %c0_46 = arith.constant 0 : index
      %135 = vector.load %arg3[%c29, %c0_46] : memref<49x512xf32, #tpu.memory_space<vmem>>, vector<1x512xf32>
      %136 = arith.mulf %135, %134 : vector<1x512xf32>
      %137 = arith.addf %133, %136 : vector<1x512xf32>
      %c497_i32 = arith.constant 497 : i32
      %138 = tpu.dynamic_rotate %17 by %c497_i32 dim 1 : vector<1x512xf32>, i32 -> vector<1x512xf32>
      %c30 = arith.constant 30 : index
      %c0_47 = arith.constant 0 : index
      %139 = vector.load %arg3[%c30, %c0_47] : memref<49x512xf32, #tpu.memory_space<vmem>>, vector<1x512xf32>
      %140 = arith.mulf %139, %138 : vector<1x512xf32>
      %141 = arith.addf %137, %140 : vector<1x512xf32>
      %c496_i32 = arith.constant 496 : i32
      %142 = tpu.dynamic_rotate %17 by %c496_i32 dim 1 : vector<1x512xf32>, i32 -> vector<1x512xf32>
      %c31 = arith.constant 31 : index
      %c0_48 = arith.constant 0 : index
      %143 = vector.load %arg3[%c31, %c0_48] : memref<49x512xf32, #tpu.memory_space<vmem>>, vector<1x512xf32>
      %144 = arith.mulf %143, %142 : vector<1x512xf32>
      %145 = arith.addf %141, %144 : vector<1x512xf32>
      %c495_i32 = arith.constant 495 : i32
      %146 = tpu.dynamic_rotate %17 by %c495_i32 dim 1 : vector<1x512xf32>, i32 -> vector<1x512xf32>
      %c32 = arith.constant 32 : index
      %c0_49 = arith.constant 0 : index
      %147 = vector.load %arg3[%c32, %c0_49] : memref<49x512xf32, #tpu.memory_space<vmem>>, vector<1x512xf32>
      %148 = arith.mulf %147, %146 : vector<1x512xf32>
      %149 = arith.addf %145, %148 : vector<1x512xf32>
      %c494_i32 = arith.constant 494 : i32
      %150 = tpu.dynamic_rotate %17 by %c494_i32 dim 1 : vector<1x512xf32>, i32 -> vector<1x512xf32>
      %c33 = arith.constant 33 : index
      %c0_50 = arith.constant 0 : index
      %151 = vector.load %arg3[%c33, %c0_50] : memref<49x512xf32, #tpu.memory_space<vmem>>, vector<1x512xf32>
      %152 = arith.mulf %151, %150 : vector<1x512xf32>
      %153 = arith.addf %149, %152 : vector<1x512xf32>
      %c493_i32 = arith.constant 493 : i32
      %154 = tpu.dynamic_rotate %17 by %c493_i32 dim 1 : vector<1x512xf32>, i32 -> vector<1x512xf32>
      %c34 = arith.constant 34 : index
      %c0_51 = arith.constant 0 : index
      %155 = vector.load %arg3[%c34, %c0_51] : memref<49x512xf32, #tpu.memory_space<vmem>>, vector<1x512xf32>
      %156 = arith.mulf %155, %154 : vector<1x512xf32>
      %157 = arith.addf %153, %156 : vector<1x512xf32>
      %c483_i32 = arith.constant 483 : i32
      %158 = tpu.dynamic_rotate %17 by %c483_i32 dim 1 : vector<1x512xf32>, i32 -> vector<1x512xf32>
      %c35 = arith.constant 35 : index
      %c0_52 = arith.constant 0 : index
      %159 = vector.load %arg3[%c35, %c0_52] : memref<49x512xf32, #tpu.memory_space<vmem>>, vector<1x512xf32>
      %160 = arith.mulf %159, %158 : vector<1x512xf32>
      %161 = arith.addf %157, %160 : vector<1x512xf32>
      %c482_i32 = arith.constant 482 : i32
      %162 = tpu.dynamic_rotate %17 by %c482_i32 dim 1 : vector<1x512xf32>, i32 -> vector<1x512xf32>
      %c36 = arith.constant 36 : index
      %c0_53 = arith.constant 0 : index
      %163 = vector.load %arg3[%c36, %c0_53] : memref<49x512xf32, #tpu.memory_space<vmem>>, vector<1x512xf32>
      %164 = arith.mulf %163, %162 : vector<1x512xf32>
      %165 = arith.addf %161, %164 : vector<1x512xf32>
      %c481_i32 = arith.constant 481 : i32
      %166 = tpu.dynamic_rotate %17 by %c481_i32 dim 1 : vector<1x512xf32>, i32 -> vector<1x512xf32>
      %c37 = arith.constant 37 : index
      %c0_54 = arith.constant 0 : index
      %167 = vector.load %arg3[%c37, %c0_54] : memref<49x512xf32, #tpu.memory_space<vmem>>, vector<1x512xf32>
      %168 = arith.mulf %167, %166 : vector<1x512xf32>
      %169 = arith.addf %165, %168 : vector<1x512xf32>
      %c480_i32 = arith.constant 480 : i32
      %170 = tpu.dynamic_rotate %17 by %c480_i32 dim 1 : vector<1x512xf32>, i32 -> vector<1x512xf32>
      %c38 = arith.constant 38 : index
      %c0_55 = arith.constant 0 : index
      %171 = vector.load %arg3[%c38, %c0_55] : memref<49x512xf32, #tpu.memory_space<vmem>>, vector<1x512xf32>
      %172 = arith.mulf %171, %170 : vector<1x512xf32>
      %173 = arith.addf %169, %172 : vector<1x512xf32>
      %c479_i32 = arith.constant 479 : i32
      %174 = tpu.dynamic_rotate %17 by %c479_i32 dim 1 : vector<1x512xf32>, i32 -> vector<1x512xf32>
      %c39 = arith.constant 39 : index
      %c0_56 = arith.constant 0 : index
      %175 = vector.load %arg3[%c39, %c0_56] : memref<49x512xf32, #tpu.memory_space<vmem>>, vector<1x512xf32>
      %176 = arith.mulf %175, %174 : vector<1x512xf32>
      %177 = arith.addf %173, %176 : vector<1x512xf32>
      %c478_i32 = arith.constant 478 : i32
      %178 = tpu.dynamic_rotate %17 by %c478_i32 dim 1 : vector<1x512xf32>, i32 -> vector<1x512xf32>
      %c40 = arith.constant 40 : index
      %c0_57 = arith.constant 0 : index
      %179 = vector.load %arg3[%c40, %c0_57] : memref<49x512xf32, #tpu.memory_space<vmem>>, vector<1x512xf32>
      %180 = arith.mulf %179, %178 : vector<1x512xf32>
      %181 = arith.addf %177, %180 : vector<1x512xf32>
      %c477_i32 = arith.constant 477 : i32
      %182 = tpu.dynamic_rotate %17 by %c477_i32 dim 1 : vector<1x512xf32>, i32 -> vector<1x512xf32>
      %c41 = arith.constant 41 : index
      %c0_58 = arith.constant 0 : index
      %183 = vector.load %arg3[%c41, %c0_58] : memref<49x512xf32, #tpu.memory_space<vmem>>, vector<1x512xf32>
      %184 = arith.mulf %183, %182 : vector<1x512xf32>
      %185 = arith.addf %181, %184 : vector<1x512xf32>
      %c467_i32 = arith.constant 467 : i32
      %186 = tpu.dynamic_rotate %17 by %c467_i32 dim 1 : vector<1x512xf32>, i32 -> vector<1x512xf32>
      %c42 = arith.constant 42 : index
      %c0_59 = arith.constant 0 : index
      %187 = vector.load %arg3[%c42, %c0_59] : memref<49x512xf32, #tpu.memory_space<vmem>>, vector<1x512xf32>
      %188 = arith.mulf %187, %186 : vector<1x512xf32>
      %189 = arith.addf %185, %188 : vector<1x512xf32>
      %c466_i32 = arith.constant 466 : i32
      %190 = tpu.dynamic_rotate %17 by %c466_i32 dim 1 : vector<1x512xf32>, i32 -> vector<1x512xf32>
      %c43 = arith.constant 43 : index
      %c0_60 = arith.constant 0 : index
      %191 = vector.load %arg3[%c43, %c0_60] : memref<49x512xf32, #tpu.memory_space<vmem>>, vector<1x512xf32>
      %192 = arith.mulf %191, %190 : vector<1x512xf32>
      %193 = arith.addf %189, %192 : vector<1x512xf32>
      %c465_i32 = arith.constant 465 : i32
      %194 = tpu.dynamic_rotate %17 by %c465_i32 dim 1 : vector<1x512xf32>, i32 -> vector<1x512xf32>
      %c44 = arith.constant 44 : index
      %c0_61 = arith.constant 0 : index
      %195 = vector.load %arg3[%c44, %c0_61] : memref<49x512xf32, #tpu.memory_space<vmem>>, vector<1x512xf32>
      %196 = arith.mulf %195, %194 : vector<1x512xf32>
      %197 = arith.addf %193, %196 : vector<1x512xf32>
      %c464_i32 = arith.constant 464 : i32
      %198 = tpu.dynamic_rotate %17 by %c464_i32 dim 1 : vector<1x512xf32>, i32 -> vector<1x512xf32>
      %c45 = arith.constant 45 : index
      %c0_62 = arith.constant 0 : index
      %199 = vector.load %arg3[%c45, %c0_62] : memref<49x512xf32, #tpu.memory_space<vmem>>, vector<1x512xf32>
      %200 = arith.mulf %199, %198 : vector<1x512xf32>
      %201 = arith.addf %197, %200 : vector<1x512xf32>
      %c463_i32 = arith.constant 463 : i32
      %202 = tpu.dynamic_rotate %17 by %c463_i32 dim 1 : vector<1x512xf32>, i32 -> vector<1x512xf32>
      %c46 = arith.constant 46 : index
      %c0_63 = arith.constant 0 : index
      %203 = vector.load %arg3[%c46, %c0_63] : memref<49x512xf32, #tpu.memory_space<vmem>>, vector<1x512xf32>
      %204 = arith.mulf %203, %202 : vector<1x512xf32>
      %205 = arith.addf %201, %204 : vector<1x512xf32>
      %c462_i32 = arith.constant 462 : i32
      %206 = tpu.dynamic_rotate %17 by %c462_i32 dim 1 : vector<1x512xf32>, i32 -> vector<1x512xf32>
      %c47 = arith.constant 47 : index
      %c0_64 = arith.constant 0 : index
      %207 = vector.load %arg3[%c47, %c0_64] : memref<49x512xf32, #tpu.memory_space<vmem>>, vector<1x512xf32>
      %208 = arith.mulf %207, %206 : vector<1x512xf32>
      %209 = arith.addf %205, %208 : vector<1x512xf32>
      %c461_i32 = arith.constant 461 : i32
      %210 = tpu.dynamic_rotate %17 by %c461_i32 dim 1 : vector<1x512xf32>, i32 -> vector<1x512xf32>
      %c48 = arith.constant 48 : index
      %c0_65 = arith.constant 0 : index
      %211 = vector.load %arg3[%c48, %c0_65] : memref<49x512xf32, #tpu.memory_space<vmem>>, vector<1x512xf32>
      %212 = arith.mulf %211, %210 : vector<1x512xf32>
      %213 = arith.addf %209, %212 : vector<1x512xf32>
      %c256_i32 = arith.constant 256 : i32
      %214 = tpu.dynamic_rotate %213 by %c256_i32 dim 1 : vector<1x512xf32>, i32 -> vector<1x512xf32>
      %215 = arith.addf %213, %214 : vector<1x512xf32>
      %216 = vector.extract_strided_slice %215 {offsets = [0, 0], sizes = [1, 256], strides = [1, 1]} : vector<1x512xf32> to vector<1x256xf32>
      %c0_66 = arith.constant 0 : index
      %217 = memref.load %arg2[%c0_66] : memref<1xf32, #tpu.memory_space<smem>>
      %218 = vector.broadcast %217 : f32 to vector<1x256xf32>
      %219 = arith.addf %216, %218 : vector<1x256xf32>
      %220 = arith.negf %219 : vector<1x256xf32>
      %221 = math.exp %220 : vector<1x256xf32>
      %cst_67 = arith.constant 1.000000e+00 : f32
      %222 = vector.broadcast %cst_67 : f32 to vector<1x256xf32>
      %223 = arith.addf %222, %221 : vector<1x256xf32>
      %224 = arith.divf %222, %223 : vector<1x256xf32>
      %c0_68 = arith.constant 0 : index
      %c0_69 = arith.constant 0 : index
      %c0_70 = arith.constant 0 : index
      %225 = vector.load %arg5[%c0_68, %c0_69, %c0_70] : memref<1x1x256xf32, #tpu.memory_space<vmem>>, vector<1x1x256xf32>
      %226 = vector.shape_cast %225 : vector<1x1x256xf32> to vector<1x256xf32>
      %227 = vector.shape_cast %224 : vector<1x256xf32> to vector<1x1x256xf32>
      tpu.vector_store %arg5[%c0_68, %c0_69, %c0_70], %227 {strides = array<i32>} : memref<1x1x256xf32, #tpu.memory_space<vmem>>, vector<1x1x256xf32>,
    } else {
    }
    return
  }
  func.func @transform_0(%arg0: i32, %arg1: i32) -> i32 {
    %c0_i32 = arith.constant 0 : i32
    %c0_i32_0 = arith.constant 0 : i32
    return %c0_i32 : i32
  }
  func.func @transform_1(%arg0: i32, %arg1: i32) -> (i32, i32) {
    %c0_i32 = arith.constant 0 : i32
    %c0_i32_0 = arith.constant 0 : i32
    %c0_i32_1 = arith.constant 0 : i32
    return %c0_i32, %c0_i32_0 : i32, i32
  }
  func.func @transform_2(%arg0: i32, %arg1: i32) -> (i32, i32, i32) {
    %c0_i32 = arith.constant 0 : i32
    %c0_i32_0 = arith.constant 0 : i32
    return %arg0, %arg1, %c0_i32 : i32, i32, i32
  }
  func.func @transform_3(%arg0: i32, %arg1: i32) -> (i32, i32, i32) {
    %c0_i32 = arith.constant 0 : i32
    %c0_i32_0 = arith.constant 0 : i32
    %c0_i32_1 = arith.constant 0 : i32
    return %arg0, %c0_i32, %c0_i32_0 : i32, i32, i32
  }
}

</mosaic_0001>

<bundles_post_ra>
// kernel: tpu_custom_call.1
= control target key start
LH: loop header
LB: loop body
LE: loop exit
PB: predicated region body
PF: predicated region fallthrough
CT: control target
= control target key end

     0   :  { %s3457_s0 = inlined_call_operand.<no memory space> [shape: f32[1], index: 0, kind: input, shape index: {}]   ;;  %s3458_s1 = inlined_call_operand.hbm [shape: f32[49,512], index: 1, kind: input, shape index: {}]   ;;  %s3459_s2 = inlined_call_operand.hbm [shape: f32[2,4,256], index: 2, kind: input, shape index: {}]   ;;  %s3460_s3 = inlined_call_operand.hbm [shape: f32[2,1,256], index: 3, kind: output, shape index: {}]  }
   0x1   :  { %8 = sst [smem:[#allocation4]] %s3457_s0 }
   0x2   :  { %9 = vsyncpa [#allocation6], 0 }
   0x3   :  { %10 = vsyncpa [#allocation9], 0 }
   0x4   :  { %12 = vsyncpa [#allocation9 + $0x1], 0 }
   0x5   :  { %13 = vsyncpa [#allocation7], 0 }
   0x6   :  { %15 = vsyncpa [#allocation7 + $0x1], 0  ;;  %s2183_s14 = smov 0   ;;  %s2185_s15 = smov 0  }
   0x7   :  { %s2187_s16 = smov 0   ;;  %s2189_s17 = smov 0  }
   0x8   :  { %s2191_s18 = smov 0   ;;  %s2193_s19 = smov 0  }
   0x9 LB: > { %s1812_s0 = sadd.s32 4294967295, %s2105_s19   ;;  %p1814_p0 = scmp.ge.s32.totalorder %s2105_s19, 1  ;;  %s2105_s19 = sphi %s2193_s19, %s21_s19   ;;  %s2101_s18 = sphi %s2191_s18, %s3473_s18   ;;  %s2097_s17 = sphi %s2189_s17, %s3472_s17   ;;  %s2093_s16 = sphi %s2187_s16, %s3471_s16   ;;  %s2089_s15 = sphi %s2185_s15, %s3470_s15   ;;  %s2085_s14 = sphi %s2183_s14, %s3469_s14  }
   0xa   : > { %p2215_p1 = scmp.eq.s32.totalorder %s1812_s0, 0  ;;  %p134_p2 = scmp.lt.s32.totalorder %s2105_s19, 3 }
   0xb   : > { %s148_s23 = sshll.u32 %s3458_s1, 4  ;;  %s2107_s25 = smov [#allocation5]   ;;  %s149_s23 = int_to_ptr.hbm [resolvable:$true] %s148_s23 }
   0xc   : > { %p2223_p3 = pnand %p1814_p0, %p134_p2  ;;  %s150_s26 = sshll.u32 %s2107_s25, 4  ;;  %s151_s26 = int_to_ptr.vmem [resolvable:$true] %s150_s26 }
   0xd   : > { %p1816_p6 = scmp.ge.s32.totalorder %s2105_s19, 2  ;;  %s2108_s27 = smov 512  }
   0xe   : > { %p1838_p4 = pneg %p2223_p3  ;;  %s2109_s28 = smov 32  }
   0xf   : > { %s1813_s29 = sadd.s32 4294967294, %s2105_s19   ;;  %s33_s30 = sadd.s32 1, %s2101_s18 }
  0x10   : > { %p1839_p5 = pnand %p1838_p4, %p2215_p1  ;;  %s84_s4 = sadd.s32 1, %s2093_s16 }
  0x11   : > { %p35_p7 = scmp.ge.s32.totalorder %s33_s30, 2  ;;  %p91_p8 = scmp.ne.s32.totalorder %s2093_s16, %s2089_s15 }
  0x12   : > { %1841 = dma.hbm_to_vmem [thread:$0]  (!%p1839_p5), %s149_s23, 3584, %s151_s26, [#allocation6], %s2108_s27, %s2108_s27, %s2109_s28  }
  0x13   : > { %p92_p9 = scmp.eq.s32.totalorder %s2105_s19, 0  ;;  %p97_p10 = scmp.ne.s32.totalorder %s2089_s15, %s2085_s14 }
  0x14   : > { %s3475_s30 = smov (%p35_p7, %s33_s30), 0  ;;  %p121_p13 = scmp.eq.s32.totalorder %s1812_s0, 1 }
  0x15   : > { %p2242_p11 = por %p92_p9, %p91_p8  ;;  %p2248_p12 = por %p2215_p1, %p97_p10 }
  0x16   : > { %s79_s7 = ssub.s32 %s2101_s18, %s3475_s30  ;;  %p127_p2 = scmp.eq.s32.totalorder %s1813_s29, 1 }
  0x17   : > { %p82_p0 = scmp.eq.s32.totalorder %s79_s7, 0  ;;  %p2254_p4 = por %p121_p13, %p91_p8 }
  0x18   : > { %p1851_p5 = scmp.lt.s32.totalorder %s2105_s19, 2  ;;  %p2262_p7 = por %p127_p2, %p97_p10 }
  0x19   : > { %s2260_s9 = scalar_select %p82_p0, %s2093_s16, %s84_s4  }
  0x1a   : > { %s164_s11 = sand.u32 1, %s2093_s16   ;;  %s1829_s13 = sshll.u32 %s2101_s18, 3 }
  0x1b   : > { %s1817_s12 = sshll.u32 %s164_s11, 3  ;;  %s175_s0 = scalar_lea.hbm %s3459_s2, %s1829_s13 }
  0x1c   : > { %s168_s23 = scalar_lea.vmem [#allocation8], %s1817_s12  ;;  %s177_s26 = sshll.u32 %s175_s0, 4  ;;  %s178_s26 = int_to_ptr.hbm [resolvable:$true] %s177_s26 }
  0x1d   : > { %s179_s25 = sshll.u32 %s168_s23, 4  ;;  %p1843_p8 = pnand %p1851_p5, %p2242_p11  ;;  %s180_s25 = int_to_ptr.vmem [resolvable:$true] %s179_s25 }
  0x1e   : > { %s165_s27 = scalar_lea.sflag [#allocation9], %s164_s11  ;;  %188 = sbr.rel (%p2223_p3) target bundleno = 739 (0x2e3), region = 32 }
  0x1f   : > { %1845 = dma.hbm_to_vmem [thread:$0]  (!%p1843_p8), %s178_s26, 128, %s180_s25, %s165_s27  }
  0x23   : > { %2072 = dma.done.wait (%p2215_p1), [#allocation6], 3584  }
  0x24   : > { %2074 = vsyncadd (%p2215_p1), [#allocation6], 4294963712  ;;  %s2280_s28 = sand.u32 1, %s2089_s15  }
  0x25   : > { %s1822_s29 = sshll.u32 %s2280_s28, 3  ;;  %s196_s4 = scalar_lea.sflag [#allocation9], %s2280_s28 }
  0x26   : > { %s199_s5 = scalar_lea.vmem [#allocation8], %s1822_s29 }
  0x27   : > { %2076 = dma.done.wait (%p2248_p12), %s196_s4, 128  }
  0x28   : > { %2078 = vsyncadd (%p2248_p12), %s196_s4, 4294967168  ;;  %v227_v0 = vlaneseq  ;;  %v2110_v2 = vmov -inf   ;;  %v2111_v3 = vmov 0.0   ;;  %v233_v4 = vld [vmem:[%s199_s5] sm:$0xff]  ;;  %vm241_vm1 = vcmask 1043456   ;;  %s2112_s20 = smov 48  }
  0x29   : > { %236 = vst [vmem:[#allocation1] ss:$2 sm:$0xff] %v233_v4  ;;  %vm259_vm2 = vcmask 1040384   ;;  %s2113_s24 = smov 50   ;;  %s2114_s6 = smov 51   ;;  %vm333_vm8 = vcmask 1042434  }
  0x2a   : > { %vm2289_vm0 = vcmp.lt.s32.totalorder %v227_v0, 256  ;;  %s2115_s7 = smov 47   ;;  %s2116_s11 = smov 49   ;;  %vm335_vm9 = vcmask 1041408  }
  0x2b   : > { %231 = vst.msk [vmem:[#allocation2] sm:$0x3] %vm2289_vm0, %v2110_v2  ;;  %s2117_s12 = smov 46   ;;  %s2118_s13 = smov 45  }
  0x2c   : > { %232 = vst.msk [vmem:[#allocation3] sm:$0x3] %vm2289_vm0, %v2111_v3  ;;  %s2119_s21 = smov 35   ;;  %s2120_s22 = smov 34  }
  0x2d   : > { %s2121_s0 = smov 33   ;;  %s2122_s23 = smov 32  }
  0x2e   : > { %s2123_s25 = smov 31   ;;  %s2124_s26 = smov 30  }
  0x2f   : > { %s2125_s27 = smov 29   ;;  %s2126_s29 = smov 19  }
  0x30   : > { %v237_v5 = vld.sshfl [vmem:[#allocation1] sm:$0xff pattern:$0x75316420]  ;;  %v238_v6 = vld.sshfl [vmem:[#allocation1 + $0x8] sm:$0xff pattern:$0x75316420] }
  0x31   : > { %v242_v7 = vsel %vm241_vm1, %v237_v5, -inf  ;;  %v249_v8 = vsel %vm241_vm1, %v238_v6, -inf  ;;  %264 = vst [vmem:[#allocation1] ss:$2 sm:$0xff] %v233_v4  ;;  %s2127_s4 = smov 18   ;;  %s2128_s5 = smov 17  }
  0x32   : > { %v243_v9 = vrot.slane %v242_v7, 4  ;;  %v250_v10 = vrot.slane %v249_v8, 4  ;;  %v234_v29 = vld [vmem:[#allocation2] sm:$0x3] }
  0x33   : > { %v263_v43 = vld [vmem:[#allocation3] sm:$0x3] }
  0x34   : > { %v244_v11 = vmax.f32 %v242_v7, %v243_v9  ;;  %v251_v12 = vmax.f32 %v249_v8, %v250_v10 }
  0x36   : > { %v245_v13 = vrot.slane %v244_v11, 2  ;;  %v252_v14 = vrot.slane %v251_v12, 2 }
  0x38   : > { %v246_v15 = vmax.f32 %v244_v11, %v245_v13  ;;  %v253_v16 = vmax.f32 %v251_v12, %v252_v14  ;;  %v265_v17 = vld.sshfl [vmem:[#allocation1] sm:$0xff pattern:$0x75316420]  ;;  %v266_v18 = vld.sshfl [vmem:[#allocation1 + $0x8] sm:$0xff pattern:$0x75316420] }
  0x39   : > { %v269_v19 = vsel %vm241_vm1, %v265_v17, 0.0  ;;  %v276_v20 = vsel %vm241_vm1, %v266_v18, 0.0 }
  0x3a   : > { %v247_v21 = vrot.slane %v246_v15, 1  ;;  %v254_v22 = vrot.slane %v253_v16, 1  ;;  %v270_v23 = vrot.slane %v269_v19, 4  ;;  %v277_v24 = vrot.slane %v276_v20, 4 }
  0x3c   : > { %v248_v25 = vmax.f32 %v246_v15, %v247_v21  ;;  %v255_v26 = vmax.f32 %v253_v16, %v254_v22  ;;  %v271_v27 = vadd.f32 %v270_v23, %v269_v19  ;;  %v278_v28 = vadd.f32 %v277_v24, %v276_v20 }
  0x3d   : > { %v2459_v24 = vand.u32 127, %v227_v0 }
  0x3e   : > { %v258_v30 = vrot.slane %v255_v26, 7  ;;  %v272_v31 = vrot.slane %v271_v27, 2  ;;  %v279_v32 = vrot.slane %v278_v28, 2 }
  0x3f   : > { %vm348_vm3 = vcmp.lt.s32.totalorder %v2459_v24, 50  ;;  %vm319_vm4 = vcmp.lt.s32.totalorder %v2459_v24, 51  ;;  %vm376_vm5 = vcmp.lt.s32.totalorder %v2459_v24, 49  ;;  %vm432_vm6 = vcmp.lt.s32.totalorder %v2459_v24, 47 }
  0x40   : > { %v260_v33 = vsel %vm259_vm2, %v248_v25, %v258_v30  ;;  %v273_v34 = vadd.f32 %v272_v31, %v271_v27  ;;  %v280_v35 = vadd.f32 %v279_v32, %v278_v28  ;;  %vm404_vm7 = vcmp.lt.s32.totalorder %v2459_v24, 48 }
  0x41   : > { %v262_v36 = vmax.f32 %v234_v29, %v260_v33  ;;  %vm460_vm10 = vcmp.lt.s32.totalorder %v2459_v24, 46  ;;  %vm488_vm11 = vcmp.lt.s32.totalorder %v2459_v24, 45  ;;  %vm516_vm12 = vcmp.lt.s32.totalorder %v2459_v24, 35 }
  0x42   : > { %v274_v37 = vrot.slane %v273_v34, 1  ;;  %v281_v38 = vrot.slane %v280_v35, 1  ;;  %vm544_vm13 = vcmp.lt.s32.totalorder %v2459_v24, 34  ;;  %vm572_vm14 = vcmp.lt.s32.totalorder %v2459_v24, 33 }
  0x43   : > { %293 = vst.msk [vmem:[#allocation2] sm:$0x3] %vm2289_vm0, %v262_v36  ;;  %v2304_v39 = vperm.slane %v262_v36, 0  ;;  %v2306_v40 = vperm.slane %v262_v36, 1  ;;  %vm600_vm15 = vcmp.lt.s32.totalorder %v2459_v24, 32  ;;  %vm628_vm1 = vcmp.lt.s32.totalorder %v2459_v24, 31 }
  0x44   : > { %v275_v41 = vadd.f32 %v274_v37, %v273_v34  ;;  %v282_v42 = vadd.f32 %v281_v38, %v280_v35 }
  0x45   : > { %398 = vrot.lane.b32.xlu1 %v2306_v40, %s2112_s20  ;;  %340 = vrot.lane.b32.xlu2 %v2304_v39, %s2113_s24 }
  0x46   : > { %v285_v44 = vrot.slane %v282_v42, 7  ;;  %309 = vrot.lane.b32.xlu0 %v2304_v39, %s2114_s6 }
  0x48   : > { %v286_v45 = vsel %vm259_vm2, %v275_v41, %v285_v44 }
  0x49   : > { %v288_v46 = vadd.f32 %v286_v45, %v263_v43 }
  0x4b   : > { %294 = vst.msk [vmem:[#allocation3] sm:$0x3] %vm2289_vm0, %v288_v46  ;;  %v298_v47 = vmul.f32 0.25, %v288_v46 }
  0x4d   : > { %424 = vrot.lane.b32.xlu1 %v2304_v39, %s2115_s7  ;;  %342 = vrot.lane.b32.xlu2 %v2306_v40, %s2113_s24  ;;  %v2317_v48 = vperm.slane %v298_v47, 0  ;;  %v2322_v49 = vperm.slane %v298_v47, 1 }
  0x4e   : > { %311 = vrot.lane.b32.xlu0 %v2306_v40, %s2114_s6 }
  0x55   : > { %313 = vrot.lane.b32.xlu1 %v2317_v48, %s2114_s6  ;;  %368 = vrot.lane.b32.xlu2 %v2304_v39, %s2116_s11 }
  0x56   : > { %370 = vrot.lane.b32.xlu0 %v2306_v40, %s2116_s11 }
  0x5d   : > { %315 = vrot.lane.b32.xlu1 %v2322_v49, %s2114_s6  ;;  %426 = vrot.lane.b32.xlu2 %v2306_v40, %s2115_s7  ;;  %s2131_s6 = smov 14  }
  0x5e   : > { %396 = vrot.lane.b32.xlu0 %v2304_v39, %s2112_s20 }
  0x65   : > { %346 = vrot.lane.b32.xlu1 %v2322_v49, %s2113_s24  ;;  %374 = vrot.lane.b32.xlu2 %v2322_v49, %s2116_s11 }
  0x66   : > { %344 = vrot.lane.b32.xlu0 %v2317_v48, %s2113_s24  ;;  %s2130_s24 = smov 15  }
  0x6d   : > { %372 = vrot.lane.b32.xlu1 %v2317_v48, %s2116_s11  ;;  %400 = vrot.lane.b32.xlu2 %v2317_v48, %s2112_s20  ;;  %s2133_s11 = smov 3  }
  0x6e   : > { %402 = vrot.lane.b32.xlu0 %v2322_v49, %s2112_s20  ;;  %s2129_s20 = smov 16  }
  0x75   : > { %430 = vrot.lane.b32.xlu1 %v2322_v49, %s2115_s7  ;;  %452 = vrot.lane.b32.xlu2 %v2304_v39, %s2117_s12 }
  0x76   : > { %428 = vrot.lane.b32.xlu0 %v2317_v48, %s2115_s7  ;;  %s2132_s7 = smov 13  }
  0x7d   : > { %456 = vrot.lane.b32.xlu1 %v2317_v48, %s2117_s12  ;;  %458 = vrot.lane.b32.xlu2 %v2322_v49, %s2117_s12 }
  0x7e   : > { %454 = vrot.lane.b32.xlu0 %v2306_v40, %s2117_s12  ;;  %s2134_s12 = smov 2  }
  0x85   : > { %482 = vrot.lane.b32.xlu1 %v2306_v40, %s2118_s13  ;;  %484 = vrot.lane.b32.xlu2 %v2317_v48, %s2118_s13 }
  0x86   : > { %480 = vrot.lane.b32.xlu0 %v2304_v39, %s2118_s13 }
  0x8d   : > { %508 = vrot.lane.b32.xlu1 %v2304_v39, %s2119_s21  ;;  %510 = vrot.lane.b32.xlu2 %v2306_v40, %s2119_s21 }
  0x8e   : > { %486 = vrot.lane.b32.xlu0 %v2322_v49, %s2118_s13  ;;  %s2135_s13 = smov 1  }
  0x95   : > { %514 = vrot.lane.b32.xlu1 %v2322_v49, %s2119_s21  ;;  %536 = vrot.lane.b32.xlu2 %v2304_v39, %s2120_s22 }
  0x96   : > { %512 = vrot.lane.b32.xlu0 %v2317_v48, %s2119_s21  ;;  %s2136_s21 = smov 127  }
  0x9d   : > { %540 = vrot.lane.b32.xlu1 %v2317_v48, %s2120_s22  ;;  %542 = vrot.lane.b32.xlu2 %v2322_v49, %s2120_s22 }
  0x9e   : > { %538 = vrot.lane.b32.xlu0 %v2306_v40, %s2120_s22  ;;  %s2137_s22 = smov 126  }
  0x9f   : > { %v2351_v50 = vpop.permute.xlu2 %340 }
  0xa5   : > { %566 = vrot.lane.b32.xlu1 %v2306_v40, %s2121_s0  ;;  %568 = vrot.lane.b32.xlu2 %v2317_v48, %s2121_s0 }
  0xa6   : > { %564 = vrot.lane.b32.xlu0 %v2304_v39, %s2121_s0 }
  0xa7   : > { %v2356_v51 = vpop.permute.xlu2 %342 }
  0xa8   : > { %v351_v32 = vsel %vm348_vm3, %v2351_v50, %v2356_v51 }
  0xa9   : > { %v359_v43 = vrot.slane %v351_v32, 7 }
  0xad   : > { %592 = vrot.lane.b32.xlu1 %v2304_v39, %s2122_s23  ;;  %594 = vrot.lane.b32.xlu2 %v2306_v40, %s2122_s23 }
  0xae   : > { %570 = vrot.lane.b32.xlu0 %v2322_v49, %s2121_s0  ;;  %s2138_s0 = smov 125  }
  0xaf   : > { %v2361_v52 = vpop.permute.xlu2 %368 }
  0xb5   : > { %598 = vrot.lane.b32.xlu1 %v2322_v49, %s2122_s23  ;;  %620 = vrot.lane.b32.xlu2 %v2304_v39, %s2123_s25 }
  0xb6   : > { %596 = vrot.lane.b32.xlu0 %v2317_v48, %s2122_s23  ;;  %s2139_s23 = smov 115  }
  0xb7   : > { %v2366_v53 = vpop.permute.xlu1 %398  ;;  %v2368_v54 = vpop.permute.xlu2 %426 }
  0xb8   : > { %v2370_v55 = vpop.permute.xlu0 %309 }
  0xbd   : > { %624 = vrot.lane.b32.xlu1 %v2317_v48, %s2123_s25  ;;  %626 = vrot.lane.b32.xlu2 %v2322_v49, %s2123_s25 }
  0xbe   : > { %622 = vrot.lane.b32.xlu0 %v2306_v40, %s2123_s25  ;;  %s2140_s25 = smov 114  }
  0xbf   : > { %v2375_v56 = vpop.permute.xlu1 %424  ;;  %v2377_v57 = vpop.permute.xlu2 %374 }
  0xc0   : > { %v2379_v58 = vpop.permute.xlu0 %311 }
  0xc1   : > { %v322_v38 = vsel %vm319_vm4, %v2370_v55, %v2379_v58 }
  0xc5   : > { %650 = vrot.lane.b32.xlu1 %v2306_v40, %s2124_s26  ;;  %652 = vrot.lane.b32.xlu2 %v2317_v48, %s2124_s26 }
  0xc6   : > { %648 = vrot.lane.b32.xlu0 %v2304_v39, %s2124_s26 }
  0xc7   : > { %v2384_v59 = vpop.permute.xlu1 %313  ;;  %v2386_v60 = vpop.permute.xlu2 %400 }
  0xc8   : > { %v2388_v61 = vpop.permute.xlu0 %370  ;;  %v321_v33 = vsel %vm319_vm4, %v2379_v58, %v2384_v59 }
  0xc9   : > { %v379_v36 = vsel %vm376_vm5, %v2361_v52, %v2388_v61  ;;  %v330_v44 = vrot.slane %v321_v33, 6 }
  0xca   : > { %v387_v58 = vrot.slane %v379_v36, 7 }
  0xcd   : > { %676 = vrot.lane.b32.xlu1 %v2304_v39, %s2125_s27  ;;  %678 = vrot.lane.b32.xlu2 %v2306_v40, %s2125_s27 }
  0xce   : > { %654 = vrot.lane.b32.xlu0 %v2322_v49, %s2124_s26  ;;  %s2141_s26 = smov 113  }
  0xcf   : > { %v2393_v62 = vpop.permute.xlu1 %315  ;;  %v2395_v63 = vpop.permute.xlu2 %452 }
  0xd0   : > { %v2397_v2 = vpop.permute.xlu0 %396  ;;  %v320_v29 = vsel %vm319_vm4, %v2384_v59, %v2393_v62  ;;  %v323_v59 = vsel %vm319_vm4, %v2393_v62, %v2370_v55  ;;  %vm712_vm4 = vcmp.lt.s32.totalorder %v2459_v24, 19 }
  0xd1   : > { %v331_v37 = vrot.slane %v320_v29, 5 }
  0xd5   : > { %682 = vrot.lane.b32.xlu1 %v2322_v49, %s2125_s27  ;;  %704 = vrot.lane.b32.xlu2 %v2304_v39, %s2126_s29 }
  0xd6   : > { %680 = vrot.lane.b32.xlu0 %v2317_v48, %s2125_s27  ;;  %s2142_s27 = smov 112  }
  0xd7   : > { %v2402_v3 = vpop.permute.xlu1 %346  ;;  %v2404_v4 = vpop.permute.xlu2 %458 }
  0xd8   : > { %v345_v5 = vpop.permute.xlu0 %344  ;;  %v352_v45 = vsel %vm348_vm3, %v2402_v3, %v2351_v50  ;;  %v329_v50 = vrot.slane %v322_v38, 7 }
  0xd9   : > { %v349_v0 = vsel %vm348_vm3, %v345_v5, %v2402_v3  ;;  %v350_v28 = vsel %vm348_vm3, %v2356_v51, %v345_v5  ;;  %v435_v51 = vsel %vm432_vm6, %v2375_v56, %v2368_v54  ;;  %v406_v3 = vsel %vm404_vm7, %v2366_v53, %v2386_v60 }
  0xda   : > { %v360_v34 = vrot.slane %v350_v28, 6  ;;  %v361_v35 = vrot.slane %v349_v0, 5  ;;  %v362_v28 = vsel %vm259_vm2, %v352_v45, %v359_v43  ;;  %v416_v36 = vrot.slane %v406_v3, 6 }
  0xdb   : > { %vm656_vm3 = vcmp.lt.s32.totalorder %v2459_v24, 30 }
  0xdd   : > { %708 = vrot.lane.b32.xlu1 %v2317_v48, %s2126_s29  ;;  %710 = vrot.lane.b32.xlu2 %v2322_v49, %s2126_s29 }
  0xde   : > { %706 = vrot.lane.b32.xlu0 %v2306_v40, %s2126_s29  ;;  %s2143_s29 = smov 111  }
  0xdf   : > { %v373_v6 = vpop.permute.xlu1 %372  ;;  %v2409_v7 = vpop.permute.xlu2 %484 }
  0xe0   : > { %v2411_v8 = vpop.permute.xlu0 %402  ;;  %v377_v30 = vsel %vm376_vm5, %v373_v6, %v2377_v57  ;;  %v378_v31 = vsel %vm376_vm5, %v2388_v61, %v373_v6  ;;  %v363_v61 = vsel %vm333_vm8, %v360_v34, %v361_v35  ;;  %v334_v6 = vsel %vm333_vm8, %v330_v44, %v331_v37  ;;  %v324_v34 = vld [vmem:[#allocation5] ss:$8 sm:$0xf] }
  0xe1   : > { %v388_v41 = vrot.slane %v378_v31, 6  ;;  %v389_v42 = vrot.slane %v377_v30, 5  ;;  %v405_v0 = vsel %vm404_vm7, %v2386_v60, %v2411_v8  ;;  %v380_v30 = vsel %vm376_vm5, %v2377_v57, %v2361_v52  ;;  %v354_v31 = vld [vmem:[#allocation5 + $0x1] ss:$8 sm:$0xf] }
  0xe2   : > { %v332_v60 = vsel %vm259_vm2, %v323_v59, %v329_v50  ;;  %v364_v32 = vsel %vm335_vm9, %v362_v28, %v363_v61  ;;  %v390_v33 = vsel %vm259_vm2, %v380_v30, %v387_v58  ;;  %v382_v52 = vld [vmem:[#allocation5 + $0x2] ss:$8 sm:$0xf]  ;;  %v443_v44 = vrot.slane %v435_v51, 7 }
  0xe3   : > { %v391_v55 = vsel %vm333_vm8, %v388_v41, %v389_v42  ;;  %v336_v35 = vsel %vm335_vm9, %v332_v60, %v334_v6  ;;  %v366_v41 = vmul.f32 %v364_v32, %v354_v31  ;;  %vm684_vm5 = vcmp.lt.s32.totalorder %v2459_v24, 29 }
  0xe4   : > { %v392_v57 = vsel %vm335_vm9, %v390_v33, %v391_v55  ;;  %v338_v45 = vmul.f32 %v336_v35, %v324_v34 }
  0xe5   : > { %734 = vrot.lane.b32.xlu1 %v2306_v40, %s2127_s4  ;;  %736 = vrot.lane.b32.xlu2 %v2317_v48, %s2127_s4  ;;  %v394_v50 = vmul.f32 %v392_v57, %v382_v52 }
  0xe6   : > { %732 = vrot.lane.b32.xlu0 %v2304_v39, %s2127_s4 }
  0xe7   : > { %v2416_v9 = vpop.permute.xlu1 %430  ;;  %v2418_v10 = vpop.permute.xlu2 %510 }
  0xe8   : > { %v2420_v11 = vpop.permute.xlu0 %428 }
  0xe9   : > { %v433_v62 = vsel %vm432_vm6, %v2420_v11, %v2416_v9  ;;  %v434_v29 = vsel %vm432_vm6, %v2368_v54, %v2420_v11  ;;  %v407_v54 = vsel %vm404_vm7, %v2397_v2, %v2366_v53  ;;  %v417_v11 = vrot.slane %v405_v0, 5 }
  0xea   : > { %v444_v37 = vrot.slane %v434_v29, 6  ;;  %v445_v38 = vrot.slane %v433_v62, 5  ;;  %v415_v58 = vrot.slane %v407_v54, 7  ;;  %v367_v62 = vadd.f32 %v366_v41, %v338_v45 }
  0xeb   : > { %v419_v3 = vsel %vm333_vm8, %v416_v36, %v417_v11  ;;  %v466_v36 = vld [vmem:[#allocation5 + $0x5] ss:$8 sm:$0xf] }
  0xec   : > { %v447_v6 = vsel %vm333_vm8, %v444_v37, %v445_v38 }
  0xed   : > { %760 = vrot.lane.b32.xlu1 %v2304_v39, %s2128_s5  ;;  %762 = vrot.lane.b32.xlu2 %v2306_v40, %s2128_s5 }
  0xee   : > { %738 = vrot.lane.b32.xlu0 %v2322_v49, %s2127_s4  ;;  %s2144_s4 = smov 110  }
  0xef   : > { %v2425_v12 = vpop.permute.xlu1 %456  ;;  %v2427_v13 = vpop.permute.xlu2 %536 }
  0xf0   : > { %v2429_v14 = vpop.permute.xlu0 %454  ;;  %v461_v42 = vsel %vm460_vm10, %v2425_v12, %v2404_v4 }
  0xf1   : > { %v462_v53 = vsel %vm460_vm10, %v2429_v14, %v2425_v12  ;;  %v463_v43 = vsel %vm460_vm10, %v2395_v63, %v2429_v14  ;;  %v408_v12 = vsel %vm404_vm7, %v2411_v8, %v2397_v2  ;;  %v436_v14 = vsel %vm432_vm6, %v2416_v9, %v2375_v56  ;;  %v410_v8 = vld [vmem:[#allocation5 + $0x3] ss:$8 sm:$0xf]  ;;  %v438_v9 = vld [vmem:[#allocation5 + $0x4] ss:$8 sm:$0xf] }
  0xf2   : > { %v473_v0 = vrot.slane %v461_v42, 5  ;;  %v471_v28 = vrot.slane %v463_v43, 7  ;;  %v472_v55 = vrot.slane %v462_v53, 6  ;;  %v418_v29 = vsel %vm259_vm2, %v408_v12, %v415_v58 }
  0xf3   : > { %v446_v30 = vsel %vm259_vm2, %v436_v14, %v443_v44  ;;  %v395_v2 = vadd.f32 %v394_v50, %v367_v62  ;;  %v420_v60 = vsel %vm335_vm9, %v418_v29, %v419_v3  ;;  %v464_v56 = vsel %vm460_vm10, %v2404_v4, %v2395_v63 }
  0xf4   : > { %v448_v31 = vsel %vm335_vm9, %v446_v30, %v447_v6  ;;  %v474_v32 = vsel %vm259_vm2, %v464_v56, %v471_v28  ;;  %v475_v33 = vsel %vm333_vm8, %v472_v55, %v473_v0  ;;  %v422_v63 = vmul.f32 %v420_v60, %v410_v8 }
  0xf5   : > { %766 = vrot.lane.b32.xlu1 %v2322_v49, %s2128_s5  ;;  %788 = vrot.lane.b32.xlu2 %v2304_v39, %s2129_s20  ;;  %v450_v4 = vmul.f32 %v448_v31, %v438_v9  ;;  %v476_v52 = vsel %vm335_vm9, %v474_v32, %v475_v33  ;;  %vm740_vm6 = vcmp.lt.s32.totalorder %v2459_v24, 18  ;;  %vm796_vm7 = vcmp.lt.s32.totalorder %v2459_v24, 16 }
  0xf6   : > { %764 = vrot.lane.b32.xlu0 %v2317_v48, %s2128_s5  ;;  %v423_v38 = vadd.f32 %v422_v63, %v395_v2  ;;  %vm768_vm10 = vcmp.lt.s32.totalorder %v2459_v24, 17  ;;  %s2145_s5 = smov 109  }
  0xf7   : > { %v2434_v15 = vpop.permute.xlu1 %482  ;;  %v2436_v16 = vpop.permute.xlu2 %542 }
  0xf8   : > { %v2438_v17 = vpop.permute.xlu0 %480  ;;  %v490_v35 = vsel %vm488_vm11, %v2434_v15, %v2409_v7  ;;  %v2645_v44 = vadd.f32 %v450_v4, %v423_v38 }
  0xf9   : > { %v491_v41 = vsel %vm488_vm11, %v2438_v17, %v2434_v15  ;;  %v500_v42 = vrot.slane %v490_v35, 6  ;;  %v2647_v15 = vmul.f32 %v476_v52, %v466_v36  ;;  %v494_v35 = vld [vmem:[#allocation5 + $0x6] ss:$8 sm:$0xf] }
  0xfa   : > { %v499_v50 = vrot.slane %v491_v41, 7 }
  0xfd   : > { %792 = vrot.lane.b32.xlu1 %v2317_v48, %s2129_s20  ;;  %794 = vrot.lane.b32.xlu2 %v2322_v49, %s2129_s20 }
  0xfe   : > { %790 = vrot.lane.b32.xlu0 %v2306_v40, %s2129_s20  ;;  %s2146_s20 = smov 99  }
  0xff   : > { %v2443_v18 = vpop.permute.xlu1 %508  ;;  %v2445_v19 = vpop.permute.xlu2 %568 }
 0x100   : > { %v2447_v20 = vpop.permute.xlu0 %486 }
 0x101   : > { %v489_v34 = vsel %vm488_vm11, %v2409_v7, %v2447_v20  ;;  %v519_v7 = vsel %vm516_vm12, %v2443_v18, %v2418_v10  ;;  %v492_v45 = vsel %vm488_vm11, %v2447_v20, %v2438_v17  ;;  %vm824_vm11 = vcmp.lt.s32.totalorder %v2459_v24, 15 }
 0x102   : > { %v501_v57 = vrot.slane %v489_v34, 5  ;;  %v527_v12 = vrot.slane %v519_v7, 7 }
 0x104   : > { %v503_v3 = vsel %vm333_vm8, %v500_v42, %v501_v57 }
 0x105   : > { %818 = vrot.lane.b32.xlu1 %v2306_v40, %s2130_s24  ;;  %820 = vrot.lane.b32.xlu2 %v2317_v48, %s2130_s24 }
 0x106   : > { %816 = vrot.lane.b32.xlu0 %v2304_v39, %s2130_s24 }
 0x107   : > { %v2452_v21 = vpop.permute.xlu1 %514  ;;  %v2454_v22 = vpop.permute.xlu2 %594 }
 0x108   : > { %v2456_v23 = vpop.permute.xlu0 %512 }
 0x109   : > { %v517_v53 = vsel %vm516_vm12, %v2456_v23, %v2452_v21  ;;  %v518_v43 = vsel %vm516_vm12, %v2418_v10, %v2456_v23  ;;  %v520_v10 = vsel %vm516_vm12, %v2452_v21, %v2443_v18  ;;  %v502_v18 = vsel %vm259_vm2, %v492_v45, %v499_v50 }
 0x10a   : > { %v528_v23 = vrot.slane %v518_v43, 6  ;;  %v529_v14 = vrot.slane %v517_v53, 5  ;;  %v548_v21 = vsel %vm544_vm13, %v2436_v16, %v2427_v13  ;;  %vm880_vm12 = vcmp.lt.s32.totalorder %v2459_v24, 13 }
 0x10c   : > { %v531_v30 = vsel %vm333_vm8, %v528_v23, %v529_v14 }
 0x10d   : > { %844 = vrot.lane.b32.xlu1 %v2304_v39, %s2131_s6  ;;  %846 = vrot.lane.b32.xlu2 %v2306_v40, %s2131_s6 }
 0x10e   : > { %822 = vrot.lane.b32.xlu0 %v2322_v49, %s2130_s24  ;;  %s2147_s24 = smov 98  }
 0x10f   : > { %v2464_v25 = vpop.permute.xlu1 %540  ;;  %v2466_v26 = vpop.permute.xlu2 %620 }
 0x110   : > { %v2469_v27 = vpop.permute.xlu0 %538  ;;  %v545_v17 = vsel %vm544_vm13, %v2464_v25, %v2436_v16 }
 0x111   : > { %v547_v58 = vsel %vm544_vm13, %v2427_v13, %v2469_v27  ;;  %v546_v20 = vsel %vm544_vm13, %v2469_v27, %v2464_v25  ;;  %v504_v25 = vsel %vm335_vm9, %v502_v18, %v503_v3  ;;  %v530_v27 = vsel %vm259_vm2, %v520_v10, %v527_v12 }
 0x112   : > { %v555_v6 = vrot.slane %v547_v58, 7  ;;  %v557_v55 = vrot.slane %v545_v17, 5  ;;  %v556_v62 = vrot.slane %v546_v20, 6  ;;  %v506_v42 = vmul.f32 %v504_v25, %v494_v35  ;;  %v578_v20 = vld [vmem:[#allocation5 + $0x21] ss:$8 sm:$0xf] }
 0x113   : > { %vm852_vm13 = vcmp.lt.s32.totalorder %v2459_v24, 14 }
 0x114   : > { %v558_v56 = vsel %vm259_vm2, %v548_v21, %v555_v6  ;;  %v559_v36 = vsel %vm333_vm8, %v556_v62, %v557_v55  ;;  %v606_v62 = vld [vmem:[#allocation5 + $0x22] ss:$8 sm:$0xf] }
 0x115   : > { %850 = vrot.lane.b32.xlu1 %v2322_v49, %s2131_s6  ;;  %872 = vrot.lane.b32.xlu2 %v2304_v39, %s2132_s7  ;;  %v560_v12 = vsel %vm335_vm9, %v558_v56, %v559_v36 }
 0x116   : > { %848 = vrot.lane.b32.xlu0 %v2317_v48, %s2131_s6  ;;  %s2148_s6 = smov 97  }
 0x117   : > { %v2515_v46 = vpop.permute.xlu1 %566  ;;  %v2517_v47 = vpop.permute.xlu2 %626 }
 0x118   : > { %v2528_v5 = vpop.permute.xlu0 %564  ;;  %v574_v9 = vsel %vm572_vm14, %v2515_v46, %v2445_v19  ;;  %v632_v34 = vsel %vm628_vm1, %v2517_v47, %v2466_v26 }
 0x11d   : > { %876 = vrot.lane.b32.xlu1 %v2317_v48, %s2132_s7  ;;  %878 = vrot.lane.b32.xlu2 %v2322_v49, %s2132_s7 }
 0x11e   : > { %874 = vrot.lane.b32.xlu0 %v2306_v40, %s2132_s7  ;;  %s2149_s7 = smov 96  }
 0x11f   : > { %v2581_v59 = vpop.permute.xlu1 %592  ;;  %v2583_v61 = vpop.permute.xlu2 %652 }
 0x120   : > { %v2594_v51 = vpop.permute.xlu0 %570  ;;  %v603_v43 = vsel %vm600_vm15, %v2581_v59, %v2454_v22 }
 0x121   : > { %v573_v13 = vsel %vm572_vm14, %v2445_v19, %v2594_v51  ;;  %v575_v19 = vsel %vm572_vm14, %v2528_v5, %v2515_v46  ;;  %v532_v46 = vsel %vm335_vm9, %v530_v27, %v531_v30  ;;  %v576_v38 = vsel %vm572_vm14, %v2594_v51, %v2528_v5  ;;  %v550_v51 = vld [vmem:[#allocation5 + $0x20] ss:$8 sm:$0xf] }
 0x122   : > { %v585_v33 = vrot.slane %v573_v13, 5  ;;  %v583_v53 = vrot.slane %v575_v19, 7  ;;  %v479_v5 = vadd.f32 %v2647_v15, %v2645_v44  ;;  %v611_v17 = vrot.slane %v603_v43, 7 }
 0x123   : > { %v562_v25 = vmul.f32 %v560_v12, %v550_v51  ;;  %vm908_vm14 = vcmp.lt.s32.totalorder %v2459_v24, 3 }
 0x124   : > { %v586_v14 = vsel %vm259_vm2, %v576_v38, %v583_v53  ;;  %v507_v6 = vadd.f32 %v506_v42, %v479_v5 }
 0x125   : > { %902 = vrot.lane.b32.xlu1 %v2306_v40, %s2133_s11  ;;  %904 = vrot.lane.b32.xlu2 %v2317_v48, %s2133_s11 }
 0x126   : > { %900 = vrot.lane.b32.xlu0 %v2304_v39, %s2133_s11 }
 0x127   : > { %v2623_v54 = vpop.permute.xlu1 %598  ;;  %v2625_v11 = vpop.permute.xlu2 %678 }
 0x128   : > { %v597_v37 = vpop.permute.xlu0 %596  ;;  %v604_v44 = vsel %vm600_vm15, %v2623_v54, %v2581_v59 }
 0x129   : > { %v601_v63 = vsel %vm600_vm15, %v597_v37, %v2623_v54  ;;  %v602_v4 = vsel %vm600_vm15, %v2454_v22, %v597_v37  ;;  %v522_v37 = vld [vmem:[#allocation5 + $0x7] ss:$8 sm:$0xf]  ;;  %v614_v27 = vsel %vm259_vm2, %v604_v44, %v611_v17  ;;  %v634_v54 = vld [vmem:[#allocation5 + $0x23] ss:$8 sm:$0xf] }
 0x12a   : > { %v612_v41 = vrot.slane %v602_v4, 6  ;;  %v613_v7 = vrot.slane %v601_v63, 5  ;;  %v534_v23 = vmul.f32 %v532_v46, %v522_v37  ;;  %v662_v4 = vld [vmem:[#allocation5 + $0x24] ss:$8 sm:$0xf]  ;;  %vm964_vm15 = vcmp.lt.s32.totalorder %v2459_v24, 1 }
 0x12c   : > { %v615_v21 = vsel %vm333_vm8, %v612_v41, %v613_v7 }
 0x12d   : > { %928 = vrot.lane.b32.xlu1 %v2304_v39, %s2134_s12  ;;  %930 = vrot.lane.b32.xlu2 %v2306_v40, %s2134_s12  ;;  %v616_v13 = vsel %vm335_vm9, %v614_v27, %v615_v21 }
 0x12e   : > { %906 = vrot.lane.b32.xlu0 %v2322_v49, %s2133_s11  ;;  %v618_v30 = vmul.f32 %v616_v13, %v606_v62  ;;  %s2150_s11 = smov 95  }
 0x12f   : > { %v625_v0 = vpop.permute.xlu1 %624  ;;  %v2686_v28 = vpop.permute.xlu2 %704 }
 0x130   : > { %v629_v16 = vsel %vm628_vm1, %v625_v0, %v2517_v47  ;;  %v623_v29 = vpop.permute.xlu0 %622  ;;  %v584_v47 = vrot.slane %v574_v9, 6 }
 0x131   : > { %v641_v2 = vrot.slane %v629_v16, 5  ;;  %v630_v8 = vsel %vm628_vm1, %v623_v29, %v625_v0  ;;  %v631_v60 = vsel %vm628_vm1, %v2466_v26, %v623_v29  ;;  %v535_v0 = vadd.f32 %v534_v23, %v507_v6 }
 0x132   : > { %v639_v31 = vrot.slane %v631_v60, 7  ;;  %v640_v32 = vrot.slane %v630_v8, 6  ;;  %v587_v45 = vsel %vm333_vm8, %v584_v47, %v585_v33  ;;  %vm936_vm1 = vcmp.lt.s32.totalorder %v2459_v24, 2 }
 0x133   : > { %v588_v18 = vsel %vm335_vm9, %v586_v14, %v587_v45  ;;  %v563_v59 = vadd.f32 %v562_v25, %v535_v0  ;;  %v690_v45 = vld [vmem:[#allocation5 + $0x25] ss:$8 sm:$0xf] }
 0x134   : > { %v642_v52 = vsel %vm259_vm2, %v632_v34, %v639_v31  ;;  %v643_v26 = vsel %vm333_vm8, %v640_v32, %v641_v2  ;;  %v590_v55 = vmul.f32 %v588_v18, %v578_v20  ;;  %v718_v18 = vld [vmem:[#allocation5 + $0x26] ss:$8 sm:$0xf] }
 0x135   : > { %v644_v57 = vsel %vm335_vm9, %v642_v52, %v643_v26  ;;  %934 = vrot.lane.b32.xlu1 %v2322_v49, %s2134_s12  ;;  %956 = vrot.lane.b32.xlu2 %v2304_v39, %s2135_s13 }
 0x136   : > { %932 = vrot.lane.b32.xlu0 %v2317_v48, %s2134_s12  ;;  %v591_v56 = vadd.f32 %v590_v55, %v563_v59  ;;  %v646_v32 = vmul.f32 %v644_v57, %v634_v54  ;;  %s2151_s12 = smov 94  }
 0x137   : > { %v651_v58 = vpop.permute.xlu1 %650  ;;  %v2742_v50 = vpop.permute.xlu2 %710 }
 0x138   : > { %v658_v3 = vsel %vm656_vm3, %v651_v58, %v2583_v61  ;;  %v649_v10 = vpop.permute.xlu0 %648  ;;  %v2754_v22 = vsel %vm712_vm4, %v2742_v50, %v2686_v28  ;;  %v619_v35 = vadd.f32 %v618_v30, %v591_v56 }
 0x139   : > { %v659_v15 = vsel %vm656_vm3, %v649_v10, %v651_v58  ;;  %v668_v33 = vrot.slane %v658_v3, 6 }
 0x13a   : > { %v667_v2 = vrot.slane %v659_v15, 7 }
 0x13d   : > { %960 = vrot.lane.b32.xlu1 %v2317_v48, %s2135_s13  ;;  %962 = vrot.lane.b32.xlu2 %v2322_v49, %s2135_s13 }
 0x13e   : > { %958 = vrot.lane.b32.xlu0 %v2306_v40, %s2135_s13  ;;  %s2152_s13 = smov 93  }
 0x13f   : > { %v677_v16 = vpop.permute.xlu1 %676  ;;  %v2774_v29 = vpop.permute.xlu2 %736 }
 0x140   : > { %v687_v8 = vsel %vm684_vm5, %v677_v16, %v2625_v11  ;;  %v655_v60 = vpop.permute.xlu0 %654 }
 0x141   : > { %v657_v9 = vsel %vm656_vm3, %v2583_v61, %v655_v60  ;;  %v660_v31 = vsel %vm656_vm3, %v655_v60, %v649_v10  ;;  %v647_v61 = vadd.f32 %v646_v32, %v619_v35  ;;  %v695_v26 = vrot.slane %v687_v8, 7  ;;  %v746_v32 = vld [vmem:[#allocation5 + $0x27] ss:$8 sm:$0xf] }
 0x142   : > { %v669_v34 = vrot.slane %v657_v9, 5  ;;  %v670_v63 = vsel %vm259_vm2, %v660_v31, %v667_v2  ;;  %vm1003_vm3 = vcmp.lt.s32.totalorder %v2459_v24, 127 }
 0x144   : > { %v671_v36 = vsel %vm333_vm8, %v668_v33, %v669_v34 }
 0x145   : > { %v672_v19 = vsel %vm335_vm9, %v670_v63, %v671_v36  ;;  %997 = vrot.lane.b32.xlu1 %v2306_v40, %s2136_s21  ;;  %999 = vrot.lane.b32.xlu2 %v2317_v48, %s2136_s21 }
 0x146   : > { %v674_v52 = vmul.f32 %v672_v19, %v662_v4  ;;  %995 = vrot.lane.b32.xlu0 %v2304_v39, %s2136_s21 }
 0x147   : > { %v683_v47 = vpop.permute.xlu1 %682  ;;  %v2790_v57 = vpop.permute.xlu2 %762 }
 0x148   : > { %v675_v37 = vadd.f32 %v674_v52, %v647_v61  ;;  %v688_v46 = vsel %vm684_vm5, %v683_v47, %v677_v16  ;;  %v681_v38 = vpop.permute.xlu0 %680 }
 0x149   : > { %v698_v41 = vsel %vm259_vm2, %v688_v46, %v695_v26  ;;  %v685_v7 = vsel %vm684_vm5, %v681_v38, %v683_v47  ;;  %v686_v42 = vsel %vm684_vm5, %v2625_v11, %v681_v38  ;;  %v774_v38 = vld [vmem:[#allocation5 + $0x40] ss:$8 sm:$0xf]  ;;  %vm1031_vm5 = vcmp.lt.s32.totalorder %v2459_v24, 126 }
 0x14a   : > { %v696_v53 = vrot.slane %v686_v42, 6  ;;  %v697_v43 = vrot.slane %v685_v7, 5 }
 0x14c   : > { %v699_v58 = vsel %vm333_vm8, %v696_v53, %v697_v43 }
 0x14d   : > { %v700_v5 = vsel %vm335_vm9, %v698_v41, %v699_v58  ;;  %1023 = vrot.lane.b32.xlu1 %v2304_v39, %s2137_s22  ;;  %1025 = vrot.lane.b32.xlu2 %v2306_v40, %s2137_s22 }
 0x14e   : > { %v702_v51 = vmul.f32 %v700_v5, %v690_v45  ;;  %1001 = vrot.lane.b32.xlu0 %v2322_v49, %s2136_s21  ;;  %s2153_s21 = smov 83  }
 0x14f   : > { %v709_v12 = vpop.permute.xlu1 %708  ;;  %v2805_v3 = vpop.permute.xlu2 %788 }
 0x150   : > { %v703_v10 = vadd.f32 %v702_v51, %v675_v37  ;;  %v713_v11 = vsel %vm712_vm4, %v709_v12, %v2742_v50  ;;  %v707_v23 = vpop.permute.xlu0 %706 }
 0x151   : > { %v725_v14 = vrot.slane %v713_v11, 5  ;;  %v714_v44 = vsel %vm712_vm4, %v707_v23, %v709_v12  ;;  %v715_v15 = vsel %vm712_vm4, %v2686_v28, %v707_v23  ;;  %v802_v23 = vld [vmem:[#allocation5 + $0x41] ss:$8 sm:$0xf]  ;;  %vm1059_vm4 = vcmp.lt.s32.totalorder %v2459_v24, 125 }
 0x152   : > { %v723_v17 = vrot.slane %v715_v15, 7  ;;  %v724_v20 = vrot.slane %v714_v44, 6 }
 0x154   : > { %v726_v21 = vsel %vm259_vm2, %v2754_v22, %v723_v17  ;;  %v727_v6 = vsel %vm333_vm8, %v724_v20, %v725_v14 }
 0x155   : > { %v728_v25 = vsel %vm335_vm9, %v726_v21, %v727_v6  ;;  %1029 = vrot.lane.b32.xlu1 %v2322_v49, %s2137_s22  ;;  %1051 = vrot.lane.b32.xlu2 %v2304_v39, %s2138_s0 }
 0x156   : > { %v730_v28 = vmul.f32 %v728_v25, %v718_v18  ;;  %1027 = vrot.lane.b32.xlu0 %v2317_v48, %s2137_s22  ;;  %s2154_s22 = smov 82  }
 0x157   : > { %v735_v50 = vpop.permute.xlu1 %734  ;;  %v795_v27 = vpop.permute.xlu2 %794 }
 0x158   : > { %v742_v22 = vsel %vm740_vm6, %v735_v50, %v2774_v29  ;;  %v733_v0 = vpop.permute.xlu0 %732  ;;  %v731_v55 = vadd.f32 %v730_v28, %v703_v10  ;;  %v800_v62 = vsel %vm796_vm7, %v795_v27, %v2805_v3 }
 0x159   : > { %v743_v13 = vsel %vm740_vm6, %v733_v0, %v735_v50  ;;  %v752_v56 = vrot.slane %v742_v22, 6 }
 0x15a   : > { %v751_v16 = vrot.slane %v743_v13, 7 }
 0x15d   : > { %1055 = vrot.lane.b32.xlu1 %v2317_v48, %s2138_s0  ;;  %1057 = vrot.lane.b32.xlu2 %v2322_v49, %s2138_s0 }
 0x15e   : > { %1053 = vrot.lane.b32.xlu0 %v2306_v40, %s2138_s0  ;;  %s2155_s0 = smov 81  }
 0x15f   : > { %v761_v59 = vpop.permute.xlu1 %760  ;;  %v2836_v54 = vpop.permute.xlu2 %820 }
 0x160   : > { %v771_v30 = vsel %vm768_vm10, %v761_v59, %v2790_v57  ;;  %v739_v2 = vpop.permute.xlu0 %738 }
 0x161   : > { %v741_v8 = vsel %vm740_vm6, %v2774_v29, %v739_v2  ;;  %v744_v60 = vsel %vm740_vm6, %v739_v2, %v733_v0  ;;  %v779_v29 = vrot.slane %v771_v30, 7  ;;  %v830_v2 = vld [vmem:[#allocation5 + $0x42] ss:$8 sm:$0xf]  ;;  %vm1087_vm6 = vcmp.lt.s32.totalorder %v2459_v24, 115 }
 0x162   : > { %v753_v9 = vrot.slane %v741_v8, 5  ;;  %v754_v31 = vsel %vm259_vm2, %v744_v60, %v751_v16 }
 0x164   : > { %v755_v33 = vsel %vm333_vm8, %v752_v56, %v753_v9 }
 0x165   : > { %v756_v34 = vsel %vm335_vm9, %v754_v31, %v755_v33  ;;  %1081 = vrot.lane.b32.xlu1 %v2306_v40, %s2139_s23  ;;  %1083 = vrot.lane.b32.xlu2 %v2317_v48, %s2139_s23 }
 0x166   : > { %v758_v63 = vmul.f32 %v756_v34, %v746_v32  ;;  %1079 = vrot.lane.b32.xlu0 %v2304_v39, %s2139_s23 }
 0x167   : > { %v767_v4 = vpop.permute.xlu1 %766  ;;  %v2852_v35 = vpop.permute.xlu2 %846 }
 0x168   : > { %v759_v36 = vadd.f32 %v758_v63, %v731_v55  ;;  %v772_v19 = vsel %vm768_vm10, %v767_v4, %v761_v59  ;;  %v765_v61 = vpop.permute.xlu0 %764 }
 0x169   : > { %v782_v52 = vsel %vm259_vm2, %v772_v19, %v779_v29  ;;  %v769_v26 = vsel %vm768_vm10, %v765_v61, %v767_v4  ;;  %v770_v47 = vsel %vm768_vm10, %v2790_v57, %v765_v61  ;;  %v858_v61 = vld [vmem:[#allocation5 + $0x43] ss:$8 sm:$0xf]  ;;  %vm1115_vm10 = vcmp.lt.s32.totalorder %v2459_v24, 114 }
 0x16a   : > { %v780_v37 = vrot.slane %v770_v47, 6  ;;  %v781_v46 = vrot.slane %v769_v26, 5 }
 0x16c   : > { %v783_v41 = vsel %vm333_vm8, %v780_v37, %v781_v46 }
 0x16d   : > { %v784_v7 = vsel %vm335_vm9, %v782_v52, %v783_v41  ;;  %1107 = vrot.lane.b32.xlu1 %v2304_v39, %s2140_s25  ;;  %1109 = vrot.lane.b32.xlu2 %v2306_v40, %s2140_s25 }
 0x16e   : > { %v786_v42 = vmul.f32 %v784_v7, %v774_v38  ;;  %1085 = vrot.lane.b32.xlu0 %v2322_v49, %s2139_s23  ;;  %s2156_s23 = smov 80  }
 0x16f   : > { %v793_v53 = vpop.permute.xlu1 %792  ;;  %v2867_v43 = vpop.permute.xlu2 %872 }
 0x170   : > { %v787_v45 = vadd.f32 %v786_v42, %v759_v36  ;;  %v797_v57 = vsel %vm796_vm7, %v793_v53, %v795_v27  ;;  %v791_v58 = vpop.permute.xlu0 %790 }
 0x171   : > { %v809_v5 = vrot.slane %v797_v57, 5  ;;  %v798_v51 = vsel %vm796_vm7, %v791_v58, %v793_v53  ;;  %v799_v12 = vsel %vm796_vm7, %v2805_v3, %v791_v58  ;;  %v886_v58 = vld [vmem:[#allocation5 + $0x44] ss:$8 sm:$0xf]  ;;  %vm1143_vm7 = vcmp.lt.s32.totalorder %v2459_v24, 113 }
 0x172   : > { %v807_v10 = vrot.slane %v799_v12, 7  ;;  %v808_v11 = vrot.slane %v798_v51, 6 }
 0x174   : > { %v810_v14 = vsel %vm259_vm2, %v800_v62, %v807_v10  ;;  %v811_v44 = vsel %vm333_vm8, %v808_v11, %v809_v5 }
 0x175   : > { %v812_v15 = vsel %vm335_vm9, %v810_v14, %v811_v44  ;;  %1113 = vrot.lane.b32.xlu1 %v2322_v49, %s2140_s25  ;;  %1135 = vrot.lane.b32.xlu2 %v2304_v39, %s2141_s26 }
 0x176   : > { %v814_v17 = vmul.f32 %v812_v15, %v802_v23  ;;  %1111 = vrot.lane.b32.xlu0 %v2317_v48, %s2140_s25  ;;  %s2157_s25 = smov 79  }
 0x177   : > { %v819_v3 = vpop.permute.xlu1 %818  ;;  %v879_v20 = vpop.permute.xlu2 %878 }
 0x178   : > { %v826_v18 = vsel %vm824_vm11, %v819_v3, %v2836_v54  ;;  %v817_v21 = vpop.permute.xlu0 %816  ;;  %v815_v6 = vadd.f32 %v814_v17, %v787_v45  ;;  %v884_v25 = vsel %vm880_vm12, %v879_v20, %v2867_v43 }
 0x179   : > { %v827_v28 = vsel %vm824_vm11, %v817_v21, %v819_v3  ;;  %v836_v59 = vrot.slane %v826_v18, 6 }
 0x17a   : > { %v835_v22 = vrot.slane %v827_v28, 7 }
 0x17d   : > { %1139 = vrot.lane.b32.xlu1 %v2317_v48, %s2141_s26  ;;  %1141 = vrot.lane.b32.xlu2 %v2322_v49, %s2141_s26 }
 0x17e   : > { %1137 = vrot.lane.b32.xlu0 %v2306_v40, %s2141_s26  ;;  %s2158_s26 = smov 78  }
 0x17f   : > { %v845_v50 = vpop.permute.xlu1 %844  ;;  %v2896_v27 = vpop.permute.xlu2 %904 }
 0x180   : > { %v855_v0 = vsel %vm852_vm13, %v845_v50, %v2852_v35  ;;  %v823_v55 = vpop.permute.xlu0 %822 }
 0x181   : > { %v825_v62 = vsel %vm824_vm11, %v2836_v54, %v823_v55  ;;  %v828_v13 = vsel %vm824_vm11, %v823_v55, %v817_v21  ;;  %v863_v54 = vrot.slane %v855_v0, 7  ;;  %v914_v55 = vld [vmem:[#allocation5 + $0x45] ss:$8 sm:$0xf]  ;;  %vm1171_vm11 = vcmp.lt.s32.totalorder %v2459_v24, 112 }
 0x182   : > { %v837_v16 = vrot.slane %v825_v62, 5  ;;  %v838_v30 = vsel %vm259_vm2, %v828_v13, %v835_v22 }
 0x184   : > { %v839_v8 = vsel %vm333_vm8, %v836_v59, %v837_v16 }
 0x185   : > { %v840_v60 = vsel %vm335_vm9, %v838_v30, %v839_v8  ;;  %1165 = vrot.lane.b32.xlu1 %v2306_v40, %s2142_s27  ;;  %1167 = vrot.lane.b32.xlu2 %v2317_v48, %s2142_s27 }
 0x186   : > { %v842_v56 = vmul.f32 %v840_v60, %v830_v2  ;;  %1163 = vrot.lane.b32.xlu0 %v2304_v39, %s2142_s27 }
 0x187   : > { %v851_v9 = vpop.permute.xlu1 %850  ;;  %v2912_v31 = vpop.permute.xlu2 %930 }
 0x188   : > { %v843_v32 = vadd.f32 %v842_v56, %v815_v6  ;;  %v856_v33 = vsel %vm852_vm13, %v851_v9, %v845_v50  ;;  %v849_v34 = vpop.permute.xlu0 %848 }
 0x189   : > { %v866_v63 = vsel %vm259_vm2, %v856_v33, %v863_v54  ;;  %v853_v29 = vsel %vm852_vm13, %v849_v34, %v851_v9  ;;  %v854_v4 = vsel %vm852_vm13, %v2852_v35, %v849_v34  ;;  %v942_v34 = vld [vmem:[#allocation5 + $0x46] ss:$8 sm:$0xf]  ;;  %vm1199_vm13 = vcmp.lt.s32.totalorder %v2459_v24, 111 }
 0x18a   : > { %v864_v36 = vrot.slane %v854_v4, 6  ;;  %v865_v19 = vrot.slane %v853_v29, 5 }
 0x18c   : > { %v867_v52 = vsel %vm333_vm8, %v864_v36, %v865_v19 }
 0x18d   : > { %v868_v26 = vsel %vm335_vm9, %v866_v63, %v867_v52  ;;  %1191 = vrot.lane.b32.xlu1 %v2304_v39, %s2143_s29  ;;  %1193 = vrot.lane.b32.xlu2 %v2306_v40, %s2143_s29 }
 0x18e   : > { %v870_v47 = vmul.f32 %v868_v26, %v858_v61  ;;  %1169 = vrot.lane.b32.xlu0 %v2322_v49, %s2142_s27  ;;  %s2159_s27 = smov 77  }
 0x18f   : > { %v877_v37 = vpop.permute.xlu1 %876  ;;  %v2927_v46 = vpop.permute.xlu2 %956 }
 0x190   : > { %v871_v38 = vadd.f32 %v870_v47, %v843_v32  ;;  %v881_v35 = vsel %vm880_vm12, %v877_v37, %v879_v20  ;;  %v875_v41 = vpop.permute.xlu0 %874 }
 0x191   : > { %v893_v7 = vrot.slane %v881_v35, 5  ;;  %v882_v42 = vsel %vm880_vm12, %v875_v41, %v877_v37  ;;  %v883_v53 = vsel %vm880_vm12, %v2867_v43, %v875_v41  ;;  %v970_v41 = vld [vmem:[#allocation5 + $0x47] ss:$8 sm:$0xf]  ;;  %vm1227_vm12 = vcmp.lt.s32.totalorder %v2459_v24, 110 }
 0x192   : > { %v891_v45 = vrot.slane %v883_v53, 7  ;;  %v892_v57 = vrot.slane %v882_v42, 6 }
 0x194   : > { %v894_v5 = vsel %vm259_vm2, %v884_v25, %v891_v45  ;;  %v895_v51 = vsel %vm333_vm8, %v892_v57, %v893_v7  ;;  %v986_v57 = vrot.slane %v2306_v40, 7 }
 0x195   : > { %v896_v12 = vsel %vm335_vm9, %v894_v5, %v895_v51  ;;  %1197 = vrot.lane.b32.xlu1 %v2322_v49, %s2143_s29  ;;  %1219 = vrot.lane.b32.xlu2 %v2304_v39, %s2144_s4 }
 0x196   : > { %v898_v10 = vmul.f32 %v896_v12, %v886_v58  ;;  %1195 = vrot.lane.b32.xlu0 %v2317_v48, %s2143_s29  ;;  %v987_v58 = vrot.slane %v2317_v48, 6  ;;  %s1680_s29 = sld [smem:[#allocation4]] }
 0x197   : > { %v903_v43 = vpop.permute.xlu1 %902  ;;  %v963_v11 = vpop.permute.xlu2 %962 }
 0x198   : > { %v910_v23 = vsel %vm908_vm14, %v903_v43, %v2896_v27  ;;  %v901_v14 = vpop.permute.xlu0 %900  ;;  %v899_v44 = vadd.f32 %v898_v10, %v871_v38  ;;  %v968_v15 = vsel %vm964_vm15, %v963_v11, %v2927_v46 }
 0x199   : > { %v911_v17 = vsel %vm908_vm14, %v901_v14, %v903_v43  ;;  %v920_v50 = vrot.slane %v910_v23, 6  ;;  %v988_v43 = vrot.slane %v2322_v49, 5 }
 0x19a   : > { %v919_v18 = vrot.slane %v911_v17, 7  ;;  %v989_v17 = vsel %vm259_vm2, %v2304_v39, %v986_v57 }
 0x19d   : > { %1223 = vrot.lane.b32.xlu1 %v2317_v48, %s2144_s4  ;;  %1225 = vrot.lane.b32.xlu2 %v2322_v49, %s2144_s4 }
 0x19e   : > { %1221 = vrot.lane.b32.xlu0 %v2306_v40, %s2144_s4  ;;  %s1823_s4 = sshll.u32 %s2280_s28, 1 }
 0x19f   : > { %v929_v3 = vpop.permute.xlu1 %928  ;;  %v2956_v20 = vpop.permute.xlu2 %999 }
 0x1a0   : > { %v939_v21 = vsel %vm936_vm1, %v929_v3, %v2912_v31  ;;  %v907_v6 = vpop.permute.xlu0 %906 }
 0x1a1   : > { %v909_v25 = vsel %vm908_vm14, %v2896_v27, %v907_v6  ;;  %v912_v28 = vsel %vm908_vm14, %v907_v6, %v901_v14  ;;  %v947_v27 = vrot.slane %v939_v21, 7  ;;  %vm1255_vm14 = vcmp.lt.s32.totalorder %v2459_v24, 109 }
 0x1a2   : > { %v921_v22 = vrot.slane %v909_v25, 5  ;;  %v922_v0 = vsel %vm259_vm2, %v912_v28, %v919_v18  ;;  %v985_v18 = vld [vmem:[#allocation5 + $0x60] ss:$8 sm:$0xf] }
 0x1a4   : > { %v923_v62 = vsel %vm333_vm8, %v920_v50, %v921_v22 }
 0x1a5   : > { %v924_v13 = vsel %vm335_vm9, %v922_v0, %v923_v62  ;;  %1249 = vrot.lane.b32.xlu1 %v2306_v40, %s2145_s5  ;;  %1251 = vrot.lane.b32.xlu2 %v2317_v48, %s2145_s5 }
 0x1a6   : > { %v926_v59 = vmul.f32 %v924_v13, %v914_v55  ;;  %1247 = vrot.lane.b32.xlu0 %v2304_v39, %s2145_s5  ;;  %v1009_v13 = vld [vmem:[#allocation5 + $0x61] ss:$8 sm:$0xf] }
 0x1a7   : > { %v935_v16 = vpop.permute.xlu1 %934  ;;  %v2972_v30 = vpop.permute.xlu2 %1025 }
 0x1a8   : > { %v927_v2 = vadd.f32 %v926_v59, %v899_v44  ;;  %v940_v8 = vsel %vm936_vm1, %v935_v16, %v929_v3  ;;  %v933_v60 = vpop.permute.xlu0 %932 }
 0x1a9   : > { %v950_v56 = vsel %vm259_vm2, %v940_v8, %v947_v27  ;;  %v937_v54 = vsel %vm936_vm1, %v933_v60, %v935_v16  ;;  %v938_v9 = vsel %vm936_vm1, %v2912_v31, %v933_v60  ;;  %vm1283_vm1 = vcmp.lt.s32.totalorder %v2459_v24, 99 }
 0x1aa   : > { %v948_v32 = vrot.slane %v938_v9, 6  ;;  %v949_v33 = vrot.slane %v937_v54, 5 }
 0x1ac   : > { %v951_v63 = vsel %vm333_vm8, %v948_v32, %v949_v33 }
 0x1ad   : > { %v952_v29 = vsel %vm335_vm9, %v950_v56, %v951_v63  ;;  %1275 = vrot.lane.b32.xlu1 %v2304_v39, %s2146_s20  ;;  %1277 = vrot.lane.b32.xlu2 %v2306_v40, %s2146_s20 }
 0x1ae   : > { %v954_v4 = vmul.f32 %v952_v29, %v942_v34  ;;  %1253 = vrot.lane.b32.xlu0 %v2322_v49, %s2145_s5  ;;  %v1037_v29 = vld [vmem:[#allocation5 + $0x62] ss:$8 sm:$0xf]  ;;  %s1826_s5 = sshll.u32 %s2097_s17, 1  ;;  %s1704_s17 = scalar_lea.sflag [#allocation7], %s2280_s28 }
 0x1af   : > { %v961_v36 = vpop.permute.xlu1 %960  ;;  %v2987_v19 = vpop.permute.xlu2 %1051 }
 0x1b0   : > { %v955_v61 = vadd.f32 %v954_v4, %v927_v2  ;;  %v965_v31 = vsel %vm964_vm15, %v961_v36, %v963_v11  ;;  %v959_v52 = vpop.permute.xlu0 %958 }
 0x1b1   : > { %v977_v26 = vrot.slane %v965_v31, 5  ;;  %v966_v47 = vsel %vm964_vm15, %v959_v52, %v961_v36  ;;  %v967_v37 = vsel %vm964_vm15, %v2927_v46, %v959_v52  ;;  %vm1311_vm15 = vcmp.lt.s32.totalorder %v2459_v24, 98 }
 0x1b2   : > { %v975_v38 = vrot.slane %v967_v37, 7  ;;  %v976_v35 = vrot.slane %v966_v47, 6 }
 0x1b4   : > { %v978_v7 = vsel %vm259_vm2, %v968_v15, %v975_v38  ;;  %v979_v42 = vsel %vm333_vm8, %v976_v35, %v977_v26  ;;  %v990_v15 = vsel %vm333_vm8, %v987_v58, %v988_v43 }
 0x1b5   : > { %v980_v53 = vsel %vm335_vm9, %v978_v7, %v979_v42  ;;  %1281 = vrot.lane.b32.xlu1 %v2322_v49, %s2146_s20  ;;  %1303 = vrot.lane.b32.xlu2 %v2304_v39, %s2147_s24  ;;  %v991_v21 = vsel %vm335_vm9, %v989_v17, %v990_v15 }
 0x1b6   : > { %v982_v45 = vmul.f32 %v980_v53, %v970_v41  ;;  %1279 = vrot.lane.b32.xlu0 %v2317_v48, %s2146_s20  ;;  %v993_v0 = vmul.f32 %v991_v21, %v985_v18 }
 0x1b7   : > { %v998_v46 = vpop.permute.xlu1 %997  ;;  %v1058_v5 = vpop.permute.xlu2 %1057 }
 0x1b8   : > { %v983_v51 = vadd.f32 %v982_v45, %v955_v61  ;;  %v1005_v12 = vsel %vm1003_vm3, %v998_v46, %v2956_v20  ;;  %v996_v10 = vpop.permute.xlu0 %995  ;;  %v1063_v11 = vsel %vm1059_vm4, %v1058_v5, %v2987_v19  ;;  %v1065_v45 = vld [vmem:[#allocation5 + $0x63] ss:$8 sm:$0xf] }
 0x1b9   : > { %v1014_v23 = vrot.slane %v1005_v12, 7  ;;  %v1006_v14 = vsel %vm1003_vm3, %v996_v10, %v998_v46  ;;  %v1072_v38 = vrot.slane %v1063_v11, 5 }
 0x1ba   : > { %v994_v16 = vadd.f32 %v993_v0, %v983_v51 }
 0x1bb   : > { %v1017_v44 = vsel %vm259_vm2, %v1006_v14, %v1014_v23 }
 0x1bd   : > { %1307 = vrot.lane.b32.xlu1 %v2317_v48, %s2147_s24  ;;  %1309 = vrot.lane.b32.xlu2 %v2322_v49, %s2147_s24 }
 0x1be   : > { %1305 = vrot.lane.b32.xlu0 %v2306_v40, %s2147_s24 }
 0x1bf   : > { %v1024_v3 = vpop.permute.xlu1 %1023  ;;  %v3024_v6 = vpop.permute.xlu2 %1083 }
 0x1c0   : > { %v1034_v25 = vsel %vm1031_vm5, %v1024_v3, %v2972_v30  ;;  %v1002_v28 = vpop.permute.xlu0 %1001 }
 0x1c1   : > { %v1004_v50 = vsel %vm1003_vm3, %v2956_v20, %v1002_v28  ;;  %v1007_v22 = vsel %vm1003_vm3, %v1002_v28, %v996_v10  ;;  %vm1339_vm3 = vcmp.lt.s32.totalorder %v2459_v24, 97 }
 0x1c2   : > { %v1015_v55 = vrot.slane %v1004_v50, 6  ;;  %v1016_v62 = vrot.slane %v1007_v22, 5  ;;  %v1093_v50 = vld [vmem:[#allocation5 + $0x64] ss:$8 sm:$0xf] }
 0x1c4   : > { %v1018_v59 = vsel %vm333_vm8, %v1015_v55, %v1016_v62 }
 0x1c5   : > { %v1019_v27 = vsel %vm335_vm9, %v1017_v44, %v1018_v59  ;;  %1333 = vrot.lane.b32.xlu1 %v2306_v40, %s2148_s6  ;;  %1335 = vrot.lane.b32.xlu2 %v2317_v48, %s2148_s6 }
 0x1c6   : > { %v1021_v2 = vmul.f32 %v1019_v27, %v1009_v13  ;;  %1331 = vrot.lane.b32.xlu0 %v2304_v39, %s2148_s6 }
 0x1c7   : > { %v1030_v20 = vpop.permute.xlu1 %1029  ;;  %v3039_v8 = vpop.permute.xlu2 %1109 }
 0x1c8   : > { %v1022_v60 = vadd.f32 %v1021_v2, %v994_v16  ;;  %v1035_v56 = vsel %vm1031_vm5, %v1030_v20, %v1024_v3  ;;  %v1028_v54 = vpop.permute.xlu0 %1027 }
 0x1c9   : > { %v1044_v9 = vrot.slane %v1035_v56, 5  ;;  %v1032_v32 = vsel %vm1031_vm5, %v1028_v54, %v1030_v20  ;;  %v1033_v33 = vsel %vm1031_vm5, %v2972_v30, %v1028_v54  ;;  %v1121_v54 = vld [vmem:[#allocation5 + $0x65] ss:$8 sm:$0xf]  ;;  %vm1367_vm5 = vcmp.lt.s32.totalorder %v2459_v24, 96 }
 0x1ca   : > { %v1042_v34 = vrot.slane %v1033_v33, 7  ;;  %v1043_v63 = vrot.slane %v1032_v32, 6 }
 0x1cc   : > { %v1045_v4 = vsel %vm259_vm2, %v1034_v25, %v1042_v34  ;;  %v1046_v36 = vsel %vm333_vm8, %v1043_v63, %v1044_v9 }
 0x1cd   : > { %v1047_v61 = vsel %vm335_vm9, %v1045_v4, %v1046_v36  ;;  %1359 = vrot.lane.b32.xlu1 %v2304_v39, %s2149_s7  ;;  %1361 = vrot.lane.b32.xlu2 %v2306_v40, %s2149_s7 }
 0x1ce   : > { %v1049_v31 = vmul.f32 %v1047_v61, %v1037_v29  ;;  %1337 = vrot.lane.b32.xlu0 %v2322_v49, %s2148_s6  ;;  %s1714_s6 = scalar_lea.hbm %s3460_s3, %s1826_s5 }
 0x1cf   : > { %v1056_v52 = vpop.permute.xlu1 %1055  ;;  %v3054_v26 = vpop.permute.xlu2 %1135 }
 0x1d0   : > { %v1060_v30 = vsel %vm1059_vm4, %v1056_v52, %v1058_v5  ;;  %v1054_v47 = vpop.permute.xlu0 %1053  ;;  %v1050_v37 = vadd.f32 %v1049_v31, %v1022_v60 }
 0x1d1   : > { %v1071_v35 = vrot.slane %v1060_v30, 6  ;;  %v1061_v41 = vsel %vm1059_vm4, %v1054_v47, %v1056_v52  ;;  %v1062_v7 = vsel %vm1059_vm4, %v2987_v19, %v1054_v47  ;;  %vm1395_vm4 = vcmp.lt.s32.totalorder %v2459_v24, 95 }
 0x1d2   : > { %v1070_v42 = vrot.slane %v1061_v41, 7 }
 0x1d3   : > { %v1074_v53 = vsel %vm333_vm8, %v1071_v35, %v1072_v38  ;;  %v1149_v38 = vld [vmem:[#allocation5 + $0x66] ss:$8 sm:$0xf] }
 0x1d4   : > { %v1073_v46 = vsel %vm259_vm2, %v1062_v7, %v1070_v42 }
 0x1d5   : > { %v1075_v57 = vsel %vm335_vm9, %v1073_v46, %v1074_v53  ;;  %1365 = vrot.lane.b32.xlu1 %v2322_v49, %s2149_s7  ;;  %1387 = vrot.lane.b32.xlu2 %v2304_v39, %s2150_s11 }
 0x1d6   : > { %v1077_v58 = vmul.f32 %v1075_v57, %v1065_v45  ;;  %1363 = vrot.lane.b32.xlu0 %v2317_v48, %s2149_s7  ;;  %s222_s7 = scalar_lea.vmem [#allocation10], %s1823_s4 }
 0x1d7   : > { %v1082_v19 = vpop.permute.xlu1 %1081  ;;  %v1142_v5 = vpop.permute.xlu2 %1141 }
 0x1d8   : > { %v1078_v51 = vadd.f32 %v1077_v58, %v1050_v37  ;;  %v1089_v12 = vsel %vm1087_vm6, %v1082_v19, %v3024_v6  ;;  %v1080_v10 = vpop.permute.xlu0 %1079  ;;  %v1147_v43 = vsel %vm1143_vm7, %v1142_v5, %v3054_v26 }
 0x1d9   : > { %v1098_v11 = vrot.slane %v1089_v12, 7  ;;  %v1090_v23 = vsel %vm1087_vm6, %v1080_v10, %v1082_v19  ;;  %v1156_v61 = vrot.slane %v1147_v43, 5 }
 0x1db   : > { %v1101_v14 = vsel %vm259_vm2, %v1090_v23, %v1098_v11 }
 0x1dd   : > { %1391 = vrot.lane.b32.xlu1 %v2317_v48, %s2150_s11  ;;  %1393 = vrot.lane.b32.xlu2 %v2322_v49, %s2150_s11 }
 0x1de   : > { %1389 = vrot.lane.b32.xlu0 %v2306_v40, %s2150_s11  ;;  %s1716_s11 = sshll.u32 %s222_s7, 4  ;;  %s1717_s11 = int_to_ptr.vmem [resolvable:$true] %s1716_s11 }
 0x1df   : > { %v1108_v44 = vpop.permute.xlu1 %1107  ;;  %v3084_v15 = vpop.permute.xlu2 %1167 }
 0x1e0   : > { %v1118_v17 = vsel %vm1115_vm10, %v1108_v44, %v3039_v8  ;;  %v1086_v3 = vpop.permute.xlu0 %1085 }
 0x1e1   : > { %v1088_v18 = vsel %vm1087_vm6, %v3024_v6, %v1086_v3  ;;  %v1091_v21 = vsel %vm1087_vm6, %v1086_v3, %v1080_v10  ;;  %vm1423_vm6 = vcmp.lt.s32.totalorder %v2459_v24, 94 }
 0x1e2   : > { %v1099_v25 = vrot.slane %v1088_v18, 6  ;;  %v1100_v28 = vrot.slane %v1091_v21, 5 }
 0x1e4   : > { %v1102_v22 = vsel %vm333_vm8, %v1099_v25, %v1100_v28 }
 0x1e5   : > { %v1103_v0 = vsel %vm335_vm9, %v1101_v14, %v1102_v22  ;;  %1417 = vrot.lane.b32.xlu1 %v2306_v40, %s2151_s12  ;;  %1419 = vrot.lane.b32.xlu2 %v2317_v48, %s2151_s12 }
 0x1e6   : > { %v1105_v55 = vmul.f32 %v1103_v0, %v1093_v50  ;;  %1415 = vrot.lane.b32.xlu0 %v2304_v39, %s2151_s12 }
 0x1e7   : > { %v1114_v62 = vpop.permute.xlu1 %1113  ;;  %v3099_v6 = vpop.permute.xlu2 %1193 }
 0x1e8   : > { %v1106_v13 = vadd.f32 %v1105_v55, %v1078_v51  ;;  %v1119_v59 = vsel %vm1115_vm10, %v1114_v62, %v1108_v44  ;;  %v1112_v27 = vpop.permute.xlu0 %1111 }
 0x1e9   : > { %v1128_v16 = vrot.slane %v1119_v59, 5  ;;  %v1116_v2 = vsel %vm1115_vm10, %v1112_v27, %v1114_v62  ;;  %v1117_v20 = vsel %vm1115_vm10, %v3039_v8, %v1112_v27  ;;  %v1205_v27 = vld [vmem:[#allocation5 + $0x80] ss:$8 sm:$0xf]  ;;  %vm1479_vm10 = vcmp.lt.s32.totalorder %v2459_v24, 83 }
 0x1ea   : > { %v1126_v60 = vrot.slane %v1117_v20, 7  ;;  %v1127_v56 = vrot.slane %v1116_v2, 6 }
 0x1ec   : > { %v1129_v9 = vsel %vm259_vm2, %v1118_v17, %v1126_v60  ;;  %v1130_v32 = vsel %vm333_vm8, %v1127_v56, %v1128_v16  ;;  %v1177_v17 = vld [vmem:[#allocation5 + $0x67] ss:$8 sm:$0xf] }
 0x1ed   : > { %v1131_v33 = vsel %vm335_vm9, %v1129_v9, %v1130_v32  ;;  %1443 = vrot.lane.b32.xlu1 %v2304_v39, %s2152_s13  ;;  %1445 = vrot.lane.b32.xlu2 %v2306_v40, %s2152_s13 }
 0x1ee   : > { %v1133_v34 = vmul.f32 %v1131_v33, %v1121_v54  ;;  %1421 = vrot.lane.b32.xlu0 %v2322_v49, %s2151_s12  ;;  %s1718_s12 = sshll.u32 %s1714_s6, 4  ;;  %s1719_s12 = int_to_ptr.hbm [resolvable:$true] %s1718_s12 }
 0x1ef   : > { %v1140_v63 = vpop.permute.xlu1 %1139  ;;  %v3114_v29 = vpop.permute.xlu2 %1219 }
 0x1f0   : > { %v1144_v8 = vsel %vm1143_vm7, %v1140_v63, %v1142_v5  ;;  %v1138_v4 = vpop.permute.xlu0 %1137  ;;  %v1134_v36 = vadd.f32 %v1133_v34, %v1106_v13 }
 0x1f1   : > { %v1155_v31 = vrot.slane %v1144_v8, 6  ;;  %v1145_v52 = vsel %vm1143_vm7, %v1138_v4, %v1140_v63  ;;  %v1146_v30 = vsel %vm1143_vm7, %v3054_v26, %v1138_v4  ;;  %vm1451_vm7 = vcmp.lt.s32.totalorder %v2459_v24, 93 }
 0x1f2   : > { %v1154_v47 = vrot.slane %v1145_v52, 7 }
 0x1f3   : > { %v1158_v37 = vsel %vm333_vm8, %v1155_v31, %v1156_v61  ;;  %v1233_v61 = vld [vmem:[#allocation5 + $0x81] ss:$8 sm:$0xf] }
 0x1f4   : > { %v1157_v35 = vsel %vm259_vm2, %v1146_v30, %v1154_v47 }
 0x1f5   : > { %v1159_v41 = vsel %vm335_vm9, %v1157_v35, %v1158_v37  ;;  %1449 = vrot.lane.b32.xlu1 %v2322_v49, %s2152_s13  ;;  %1471 = vrot.lane.b32.xlu2 %v2304_v39, %s2153_s21 }
 0x1f6   : > { %v1161_v7 = vmul.f32 %v1159_v41, %v1149_v38  ;;  %1447 = vrot.lane.b32.xlu0 %v2317_v48, %s2152_s13  ;;  %s2033_s13 = sshra.s32 %s1719_s12, 4  ;;  %s2034_s13 = int_to_ptr.hbm [resolvable:$true] %s2033_s13 }
 0x1f7   : > { %v1166_v26 = vpop.permute.xlu1 %1165  ;;  %v1226_v42 = vpop.permute.xlu2 %1225  ;;  %p2040_p10 = scmp.lt.s32.totalorder %s2034_s13, %s3460_s3 }
 0x1f8   : > { %v1162_v53 = vadd.f32 %v1161_v7, %v1134_v36  ;;  %v1173_v45 = vsel %vm1171_vm11, %v1166_v26, %v3084_v15  ;;  %v1164_v46 = vpop.permute.xlu0 %1163  ;;  %v1231_v57 = vsel %vm1227_vm12, %v1226_v42, %v3114_v29 }
 0x1f9   : > { %v1182_v58 = vrot.slane %v1173_v45, 7  ;;  %v1174_v19 = vsel %vm1171_vm11, %v1164_v46, %v1166_v26  ;;  %v1240_v33 = vrot.slane %v1231_v57, 5 }
 0x1fb   : > { %v1185_v5 = vsel %vm259_vm2, %v1174_v19, %v1182_v58 }
 0x1fd   : > { %1475 = vrot.lane.b32.xlu1 %v2317_v48, %s2153_s21  ;;  %1477 = vrot.lane.b32.xlu2 %v2322_v49, %s2153_s21 }
 0x1fe   : > { %1473 = vrot.lane.b32.xlu0 %v2306_v40, %s2153_s21  ;;  %s2035_s21 = scalar_lea.hbm %s2034_s13, 2 }
 0x1ff   : > { %v1192_v51 = vpop.permute.xlu1 %1191  ;;  %v3144_v12 = vpop.permute.xlu2 %1251  ;;  %p2036_p1 = scmp.ne.s32.totalorder %s2034_s13, %s2035_s21 }
 0x200   : > { %v1202_v10 = vsel %vm1199_vm13, %v1192_v51, %v3099_v6  ;;  %v1170_v43 = vpop.permute.xlu0 %1169 }
 0x201   : > { %v1172_v11 = vsel %vm1171_vm11, %v3084_v15, %v1170_v43  ;;  %v1175_v23 = vsel %vm1171_vm11, %v1170_v43, %v1164_v46  ;;  %vm1507_vm11 = vcmp.lt.s32.totalorder %v2459_v24, 82  ;;  %p2037_p3 = pnand %p2036_p1, %p2254_p4 }
 0x202   : > { %v1183_v14 = vrot.slane %v1172_v11, 6  ;;  %v1184_v44 = vrot.slane %v1175_v23, 5 }
 0x203   : > { %p2038_p9 = pneg %p2037_p3 }
 0x204   : > { %v1186_v3 = vsel %vm333_vm8, %v1183_v14, %v1184_v44 }
 0x205   : > { %v1187_v18 = vsel %vm335_vm9, %v1185_v5, %v1186_v3  ;;  %1501 = vrot.lane.b32.xlu1 %v2306_v40, %s2154_s22  ;;  %1503 = vrot.lane.b32.xlu2 %v2317_v48, %s2154_s22 }
 0x206   : > { %v1189_v21 = vmul.f32 %v1187_v18, %v1177_v17  ;;  %1499 = vrot.lane.b32.xlu0 %v2304_v39, %s2154_s22 }
 0x207   : > { %v1198_v25 = vpop.permute.xlu1 %1197  ;;  %v3159_v15 = vpop.permute.xlu2 %1277 }
 0x208   : > { %v1190_v28 = vadd.f32 %v1189_v21, %v1162_v53  ;;  %v1203_v50 = vsel %vm1199_vm13, %v1198_v25, %v1192_v51  ;;  %v1196_v22 = vpop.permute.xlu0 %1195 }
 0x209   : > { %v1212_v0 = vrot.slane %v1203_v50, 5  ;;  %v1200_v55 = vsel %vm1199_vm13, %v1196_v22, %v1198_v25  ;;  %v1201_v62 = vsel %vm1199_vm13, %v3099_v6, %v1196_v22  ;;  %v1289_v22 = vld [vmem:[#allocation5 + $0x83] ss:$8 sm:$0xf]  ;;  %vm1563_vm13 = vcmp.lt.s32.totalorder %v2459_v24, 80 }
 0x20a   : > { %v1210_v13 = vrot.slane %v1201_v62, 7  ;;  %v1211_v59 = vrot.slane %v1200_v55, 6 }
 0x20c   : > { %v1213_v16 = vsel %vm259_vm2, %v1202_v10, %v1210_v13  ;;  %v1214_v2 = vsel %vm333_vm8, %v1211_v59, %v1212_v0  ;;  %v1261_v10 = vld [vmem:[#allocation5 + $0x82] ss:$8 sm:$0xf] }
 0x20d   : > { %v1215_v20 = vsel %vm335_vm9, %v1213_v16, %v1214_v2  ;;  %1527 = vrot.lane.b32.xlu1 %v2304_v39, %s2155_s0  ;;  %1529 = vrot.lane.b32.xlu2 %v2306_v40, %s2155_s0 }
 0x20e   : > { %v1217_v60 = vmul.f32 %v1215_v20, %v1205_v27  ;;  %1505 = vrot.lane.b32.xlu0 %v2322_v49, %s2154_s22 }
 0x20f   : > { %v1224_v56 = vpop.permute.xlu1 %1223  ;;  %v3174_v54 = vpop.permute.xlu2 %1303 }
 0x210   : > { %v1228_v6 = vsel %vm1227_vm12, %v1224_v56, %v1226_v42  ;;  %v1222_v9 = vpop.permute.xlu0 %1221  ;;  %v1218_v32 = vadd.f32 %v1217_v60, %v1190_v28 }
 0x211   : > { %v1239_v34 = vrot.slane %v1228_v6, 6  ;;  %v1229_v63 = vsel %vm1227_vm12, %v1222_v9, %v1224_v56  ;;  %v1230_v8 = vsel %vm1227_vm12, %v3114_v29, %v1222_v9  ;;  %vm1535_vm12 = vcmp.lt.s32.totalorder %v2459_v24, 81 }
 0x212   : > { %v1238_v4 = vrot.slane %v1229_v63, 7 }
 0x213   : > { %v1242_v36 = vsel %vm333_vm8, %v1239_v34, %v1240_v33  ;;  %v1317_v33 = vld [vmem:[#allocation5 + $0x84] ss:$8 sm:$0xf] }
 0x214   : > { %v1241_v31 = vsel %vm259_vm2, %v1230_v8, %v1238_v4 }
 0x215   : > { %v1243_v52 = vsel %vm335_vm9, %v1241_v31, %v1242_v36  ;;  %1533 = vrot.lane.b32.xlu1 %v2322_v49, %s2155_s0  ;;  %1555 = vrot.lane.b32.xlu2 %v2304_v39, %s2156_s23 }
 0x216   : > { %v1245_v30 = vmul.f32 %v1243_v52, %v1233_v61  ;;  %1531 = vrot.lane.b32.xlu0 %v2317_v48, %s2155_s0 }
 0x217   : > { %v1250_v29 = vpop.permute.xlu1 %1249  ;;  %v1310_v47 = vpop.permute.xlu2 %1309 }
 0x218   : > { %v1246_v37 = vadd.f32 %v1245_v30, %v1218_v32  ;;  %v1257_v38 = vsel %vm1255_vm14, %v1250_v29, %v3144_v12  ;;  %v1248_v35 = vpop.permute.xlu0 %1247  ;;  %v1315_v41 = vsel %vm1311_vm15, %v1310_v47, %v3174_v54 }
 0x219   : > { %v1266_v7 = vrot.slane %v1257_v38, 7  ;;  %v1258_v26 = vsel %vm1255_vm14, %v1248_v35, %v1250_v29  ;;  %v1324_v20 = vrot.slane %v1315_v41, 5 }
 0x21b   : > { %v1269_v42 = vsel %vm259_vm2, %v1258_v26, %v1266_v7 }
 0x21d   : > { %1559 = vrot.lane.b32.xlu1 %v2317_v48, %s2156_s23  ;;  %1561 = vrot.lane.b32.xlu2 %v2322_v49, %s2156_s23 }
 0x21e   : > { %1557 = vrot.lane.b32.xlu0 %v2306_v40, %s2156_s23  ;;  %s2039_s23 = scalar_lea.hbm %s3460_s3, 4 }
 0x21f   : > { %v1276_v53 = vpop.permute.xlu1 %1275  ;;  %v3204_v45 = vpop.permute.xlu2 %1335  ;;  %p2041_p11 = scmp.lt.s32.totalorder %s2039_s23, %s2035_s21 }
 0x220   : > { %v1286_v46 = vsel %vm1283_vm1, %v1276_v53, %v3159_v15  ;;  %v1254_v57 = vpop.permute.xlu0 %1253 }
 0x221   : > { %v1256_v58 = vsel %vm1255_vm14, %v3144_v12, %v1254_v57  ;;  %v1259_v19 = vsel %vm1255_vm14, %v1254_v57, %v1248_v35  ;;  %vm1591_vm14 = vcmp.lt.s32.totalorder %v2459_v24, 79  ;;  %p2042_p12 = por %p2041_p11, %p2040_p10 }
 0x222   : > { %v1267_v5 = vrot.slane %v1256_v58, 6  ;;  %v1268_v51 = vrot.slane %v1259_v19, 5 }
 0x223   : > { %p2043_p13 = pnand %p2042_p12, %p2038_p9 }
 0x224   : > { %v1270_v43 = vsel %vm333_vm8, %v1267_v5, %v1268_v51 }
 0x225   : > { %v1271_v11 = vsel %vm335_vm9, %v1269_v42, %v1270_v43  ;;  %1585 = vrot.lane.b32.xlu1 %v2306_v40, %s2157_s25  ;;  %1587 = vrot.lane.b32.xlu2 %v2317_v48, %s2157_s25  ;;  %v1345_v42 = vld [vmem:[#allocation5 + $0x85] ss:$8 sm:$0xf] }
 0x226   : > { %v1273_v23 = vmul.f32 %v1271_v11, %v1261_v10  ;;  %1583 = vrot.lane.b32.xlu0 %v2304_v39, %s2157_s25 }
 0x227   : > { %v1282_v14 = vpop.permute.xlu1 %1281  ;;  %v3219_v12 = vpop.permute.xlu2 %1361 }
 0x228   : > { %v1274_v44 = vadd.f32 %v1273_v23, %v1246_v37  ;;  %v1287_v17 = vsel %vm1283_vm1, %v1282_v14, %v1276_v53  ;;  %v1280_v3 = vpop.permute.xlu0 %1279  ;;  %v1373_v23 = vld [vmem:[#allocation5 + $0x86] ss:$8 sm:$0xf] }
 0x229   : > { %v1296_v18 = vrot.slane %v1287_v17, 5  ;;  %v1284_v21 = vsel %vm1283_vm1, %v1280_v3, %v1282_v14  ;;  %v1285_v25 = vsel %vm1283_vm1, %v3159_v15, %v1280_v3  ;;  %vm1647_vm1 = vcmp.lt.s32.totalorder %v2459_v24, 77 }
 0x22a   : > { %v1294_v28 = vrot.slane %v1285_v25, 7  ;;  %v1295_v50 = vrot.slane %v1284_v21, 6 }
 0x22c   : > { %v1297_v0 = vsel %vm259_vm2, %v1286_v46, %v1294_v28  ;;  %v1298_v55 = vsel %vm333_vm8, %v1295_v50, %v1296_v18 }
 0x22d   : > { %v1299_v62 = vsel %vm335_vm9, %v1297_v0, %v1298_v55  ;;  %1611 = vrot.lane.b32.xlu1 %v2304_v39, %s2158_s26  ;;  %1613 = vrot.lane.b32.xlu2 %v2306_v40, %s2158_s26 }
 0x22e   : > { %v1301_v13 = vmul.f32 %v1299_v62, %v1289_v22  ;;  %1589 = vrot.lane.b32.xlu0 %v2322_v49, %s2157_s25 }
 0x22f   : > { %v1308_v59 = vpop.permute.xlu1 %1307  ;;  %v3234_v27 = vpop.permute.xlu2 %1387 }
 0x230   : > { %v1312_v15 = vsel %vm1311_vm15, %v1308_v59, %v1310_v47  ;;  %v1306_v16 = vpop.permute.xlu0 %1305  ;;  %v1302_v2 = vadd.f32 %v1301_v13, %v1274_v44 }
 0x231   : > { %v1323_v60 = vrot.slane %v1312_v15, 6  ;;  %v1313_v56 = vsel %vm1311_vm15, %v1306_v16, %v1308_v59  ;;  %v1314_v6 = vsel %vm1311_vm15, %v3174_v54, %v1306_v16  ;;  %v1401_v59 = vld [vmem:[#allocation5 + $0x87] ss:$8 sm:$0xf]  ;;  %vm1619_vm15 = vcmp.lt.s32.totalorder %v2459_v24, 78 }
 0x232   : > { %v1322_v9 = vrot.slane %v1313_v56, 7 }
 0x233   : > { %v1326_v32 = vsel %vm333_vm8, %v1323_v60, %v1324_v20 }
 0x234   : > { %v1325_v34 = vsel %vm259_vm2, %v1314_v6, %v1322_v9 }
 0x235   : > { %v1327_v63 = vsel %vm335_vm9, %v1325_v34, %v1326_v32  ;;  %1617 = vrot.lane.b32.xlu1 %v2322_v49, %s2158_s26  ;;  %1639 = vrot.lane.b32.xlu2 %v2304_v39, %s2159_s27 }
 0x236   : > { %v1329_v8 = vmul.f32 %v1327_v63, %v1317_v33  ;;  %1615 = vrot.lane.b32.xlu0 %v2317_v48, %s2158_s26 }
 0x237   : > { %v1334_v54 = vpop.permute.xlu1 %1333  ;;  %v1394_v4 = vpop.permute.xlu2 %1393 }
 0x238   : > { %v1330_v36 = vadd.f32 %v1329_v8, %v1302_v2  ;;  %v1341_v61 = vsel %vm1339_vm3, %v1334_v54, %v3204_v45  ;;  %v1332_v31 = vpop.permute.xlu0 %1331  ;;  %v1399_v52 = vsel %vm1395_vm4, %v1394_v4, %v3234_v27 }
 0x239   : > { %v1350_v30 = vrot.slane %v1341_v61, 7  ;;  %v1342_v39 = vsel %vm1339_vm3, %v1332_v31, %v1334_v54  ;;  %v1408_v50 = vrot.slane %v1399_v52, 5 }
 0x23b   : > { %v1353_v29 = vsel %vm259_vm2, %v1342_v39, %v1350_v30 }
 0x23d   : > { %1643 = vrot.lane.b32.xlu1 %v2317_v48, %s2159_s27  ;;  %1645 = vrot.lane.b32.xlu2 %v2322_v49, %s2159_s27 }
 0x23e   : > { %1641 = vrot.lane.b32.xlu0 %v2306_v40, %s2159_s27 }
 0x23f   : > { %v1360_v47 = vpop.permute.xlu1 %1359  ;;  %v1420_v37 = vpop.permute.xlu2 %1419 }
 0x240   : > { %v1370_v38 = vsel %vm1367_vm5, %v1360_v47, %v3219_v12  ;;  %v1338_v35 = vpop.permute.xlu0 %1337 }
 0x241   : > { %v1340_v41 = vsel %vm1339_vm3, %v3204_v45, %v1338_v35  ;;  %v1343_v48 = vsel %vm1339_vm3, %v1338_v35, %v1332_v31  ;;  %v1429_v31 = vld [vmem:[#allocation5 + $0xa0] ss:$8 sm:$0xf] }
 0x242   : > { %v1351_v7 = vrot.slane %v1340_v41, 6  ;;  %v1352_v26 = vrot.slane %v1343_v48, 5 }
 0x244   : > { %v1354_v49 = vsel %vm333_vm8, %v1351_v7, %v1352_v26 }
 0x245   : > { %v1355_v40 = vsel %vm335_vm9, %v1353_v29, %v1354_v49  ;;  %v1457_v49 = vld [vmem:[#allocation5 + $0xa1] ss:$8 sm:$0xf] }
 0x246   : > { %v1357_v53 = vmul.f32 %v1355_v40, %v1345_v42 }
 0x247   : > { %v1366_v46 = vpop.permute.xlu1 %1365  ;;  %v1446_v57 = vpop.permute.xlu2 %1445 }
 0x248   : > { %v1358_v58 = vadd.f32 %v1357_v53, %v1330_v36  ;;  %v1371_v19 = vsel %vm1367_vm5, %v1366_v46, %v1360_v47  ;;  %v1364_v5 = vpop.permute.xlu0 %1363 }
 0x249   : > { %v1380_v51 = vrot.slane %v1371_v19, 5  ;;  %v1368_v45 = vsel %vm1367_vm5, %v1364_v5, %v1366_v46  ;;  %v1369_v10 = vsel %vm1367_vm5, %v3219_v12, %v1364_v5 }
 0x24a   : > { %v1378_v43 = vrot.slane %v1369_v10, 7  ;;  %v1379_v11 = vrot.slane %v1368_v45, 6 }
 0x24c   : > { %v1381_v14 = vsel %vm259_vm2, %v1370_v38, %v1378_v43  ;;  %v1382_v44 = vsel %vm333_vm8, %v1379_v11, %v1380_v51 }
 0x24d   : > { %v1383_v17 = vsel %vm335_vm9, %v1381_v14, %v1382_v44 }
 0x24e   : > { %v1385_v3 = vmul.f32 %v1383_v17, %v1373_v23 }
 0x24f   : > { %v1392_v18 = vpop.permute.xlu1 %1391  ;;  %v3291_v55 = vpop.permute.xlu2 %1471 }
 0x250   : > { %v1396_v21 = vsel %vm1395_vm4, %v1392_v18, %v1394_v4  ;;  %v1390_v25 = vpop.permute.xlu0 %1389  ;;  %v1386_v28 = vadd.f32 %v1385_v3, %v1358_v58 }
 0x251   : > { %v1407_v22 = vrot.slane %v1396_v21, 6  ;;  %v1397_v12 = vsel %vm1395_vm4, %v1390_v25, %v1392_v18  ;;  %v1398_v0 = vsel %vm1395_vm4, %v3234_v27, %v1390_v25 }
 0x252   : > { %v1406_v62 = vrot.slane %v1397_v12, 7 }
 0x253   : > { %v1410_v13 = vsel %vm333_vm8, %v1407_v22, %v1408_v50 }
 0x254   : > { %v1409_v15 = vsel %vm259_vm2, %v1398_v0, %v1406_v62 }
 0x255   : > { %v1411_v16 = vsel %vm335_vm9, %v1409_v15, %v1410_v13 }
 0x256   : > { %v1413_v2 = vmul.f32 %v1411_v16, %v1401_v59 }
 0x257   : > { %v1418_v20 = vpop.permute.xlu1 %1417  ;;  %v1478_v33 = vpop.permute.xlu2 %1477 }
 0x258   : > { %v1414_v60 = vadd.f32 %v1413_v2, %v1386_v28  ;;  %v1425_v56 = vsel %vm1423_vm6, %v1418_v20, %v1420_v37  ;;  %v1416_v6 = vpop.permute.xlu0 %1415  ;;  %v1483_v12 = vsel %vm1479_vm10, %v1478_v33, %v3291_v55 }
 0x259   : > { %v1434_v9 = vrot.slane %v1425_v56, 7  ;;  %v1426_v32 = vsel %vm1423_vm6, %v1416_v6, %v1418_v20  ;;  %v1492_v59 = vrot.slane %v1483_v12, 5 }
 0x25b   : > { %v1437_v27 = vsel %vm259_vm2, %v1426_v32, %v1434_v9 }
 0x25f   : > { %v1444_v34 = vpop.permute.xlu1 %1443  ;;  %v1504_v39 = vpop.permute.xlu2 %1503 }
 0x260   : > { %v1454_v63 = vsel %vm1451_vm7, %v1444_v34, %v1446_v57  ;;  %v1422_v8 = vpop.permute.xlu0 %1421 }
 0x261   : > { %v1424_v54 = vsel %vm1423_vm6, %v1420_v37, %v1422_v8  ;;  %v1427_v4 = vsel %vm1423_vm6, %v1422_v8, %v1416_v6 }
 0x262   : > { %v1435_v36 = vrot.slane %v1424_v54, 6  ;;  %v1436_v61 = vrot.slane %v1427_v4, 5 }
 0x264   : > { %v1438_v52 = vsel %vm333_vm8, %v1435_v36, %v1436_v61 }
 0x265   : > { %v1439_v30 = vsel %vm335_vm9, %v1437_v27, %v1438_v52  ;;  %v1485_v27 = vld [vmem:[#allocation5 + $0xa2] ss:$8 sm:$0xf] }
 0x266   : > { %v1441_v29 = vmul.f32 %v1439_v30, %v1429_v31 }
 0x267   : > { %v1450_v47 = vpop.permute.xlu1 %1449  ;;  %v1530_v5 = vpop.permute.xlu2 %1529 }
 0x268   : > { %v1442_v38 = vadd.f32 %v1441_v29, %v1414_v60  ;;  %v1455_v35 = vsel %vm1451_vm7, %v1450_v47, %v1444_v34  ;;  %v1448_v41 = vpop.permute.xlu0 %1447 }
 0x269   : > { %v1464_v48 = vrot.slane %v1455_v35, 5  ;;  %v1452_v37 = vsel %vm1451_vm7, %v1448_v41, %v1450_v47  ;;  %v1453_v7 = vsel %vm1451_vm7, %v1446_v57, %v1448_v41 }
 0x26a   : > { %v1462_v26 = vrot.slane %v1453_v7, 7  ;;  %v1463_v42 = vrot.slane %v1452_v37, 6 }
 0x26c   : > { %v1465_v40 = vsel %vm259_vm2, %v1454_v63, %v1462_v26  ;;  %v1466_v53 = vsel %vm333_vm8, %v1463_v42, %v1464_v48 }
 0x26d   : > { %v1467_v46 = vsel %vm335_vm9, %v1465_v40, %v1466_v53 }
 0x26e   : > { %v1469_v58 = vmul.f32 %v1467_v46, %v1457_v49 }
 0x26f   : > { %v1476_v19 = vpop.permute.xlu1 %1475  ;;  %v3314_v11 = vpop.permute.xlu2 %1555 }
 0x270   : > { %v1474_v51 = vpop.permute.xlu0 %1473  ;;  %v3312_v45 = vadd.f32 %v1469_v58, %v1442_v38  ;;  %v1480_v25 = vsel %vm1479_vm10, %v1476_v19, %v1478_v33 }
 0x271   : > { %v1481_v28 = vsel %vm1479_vm10, %v1474_v51, %v1476_v19  ;;  %v1491_v62 = vrot.slane %v1480_v25, 6  ;;  %v1482_v15 = vsel %vm1479_vm10, %v3291_v55, %v1474_v51  ;;  %v1513_v51 = vld [vmem:[#allocation5 + $0xa3] ss:$8 sm:$0xf] }
 0x272   : > { %v1490_v13 = vrot.slane %v1481_v28, 7 }
 0x273   : > { %v1494_v16 = vsel %vm333_vm8, %v1491_v62, %v1492_v59 }
 0x274   : > { %v1493_v2 = vsel %vm259_vm2, %v1482_v15, %v1490_v13  ;;  %v1569_v13 = vld [vmem:[#allocation5 + $0xa5] ss:$8 sm:$0xf] }
 0x275   : > { %v1495_v33 = vsel %vm335_vm9, %v1493_v2, %v1494_v16 }
 0x276   : > { %v1497_v29 = vmul.f32 %v1495_v33, %v1485_v27 }
 0x277   : > { %v1502_v10 = vpop.permute.xlu1 %1501  ;;  %v1562_v14 = vpop.permute.xlu2 %1561 }
 0x278   : > { %v1500_v43 = vpop.permute.xlu0 %1499  ;;  %v1509_v56 = vsel %vm1507_vm11, %v1502_v10, %v1504_v39  ;;  %v1567_v4 = vsel %vm1563_vm13, %v1562_v14, %v3314_v11  ;;  %v1498_v19 = vadd.f32 %v1497_v29, %v3312_v45  ;;  %v1541_v45 = vld [vmem:[#allocation5 + $0xa4] ss:$8 sm:$0xf] }
 0x279   : > { %v1518_v54 = vrot.slane %v1509_v56, 7  ;;  %v1510_v35 = vsel %vm1507_vm11, %v1500_v43, %v1502_v10  ;;  %v1576_v42 = vrot.slane %v1567_v4, 5 }
 0x27b   : > { %v1521_v7 = vsel %vm259_vm2, %v1510_v35, %v1518_v54 }
 0x27f   : > { %v1528_v57 = vpop.permute.xlu1 %1527  ;;  %v1588_v3 = vpop.permute.xlu2 %1587 }
 0x280   : > { %v1506_v23 = vpop.permute.xlu0 %1505  ;;  %v1538_v26 = vsel %vm1535_vm12, %v1528_v57, %v1530_v5 }
 0x281   : > { %v1508_v20 = vsel %vm1507_vm11, %v1504_v39, %v1506_v23  ;;  %v1511_v60 = vsel %vm1507_vm11, %v1506_v23, %v1500_v43 }
 0x282   : > { %v1519_v34 = vrot.slane %v1508_v20, 6  ;;  %v1520_v63 = vrot.slane %v1511_v60, 5 }
 0x284   : > { %v1522_v41 = vsel %vm333_vm8, %v1519_v34, %v1520_v63 }
 0x285   : > { %v1523_v10 = vsel %vm335_vm9, %v1521_v7, %v1522_v41 }
 0x287   : > { %v1534_v44 = vpop.permute.xlu1 %1533  ;;  %v3319_v22 = vpop.permute.xlu2 %1613 }
 0x288   : > { %v1532_v17 = vpop.permute.xlu0 %1531  ;;  %v1539_v55 = vsel %vm1535_vm12, %v1534_v44, %v1528_v57 }
 0x289   : > { %v1536_v6 = vsel %vm1535_vm12, %v1532_v17, %v1534_v44  ;;  %v1537_v9 = vsel %vm1535_vm12, %v1530_v5, %v1532_v17  ;;  %v1548_v52 = vrot.slane %v1539_v55, 5 }
 0x28a   : > { %v1546_v30 = vrot.slane %v1537_v9, 7  ;;  %v1547_v39 = vrot.slane %v1536_v6, 6  ;;  %v1597_v6 = vld [vmem:[#allocation5 + $0xa6] ss:$8 sm:$0xf] }
 0x28c   : > { %v1549_v40 = vsel %vm259_vm2, %v1538_v26, %v1546_v30  ;;  %v1550_v53 = vsel %vm333_vm8, %v1547_v39, %v1548_v52 }
 0x28f   : > { %v1560_v18 = vpop.permute.xlu1 %1559  ;;  %v3350_v31 = vpop.permute.xlu2 %1639 }
 0x290   : > { %v1558_v21 = vpop.permute.xlu0 %1557  ;;  %v1564_v36 = vsel %vm1563_vm13, %v1560_v18, %v1562_v14 }
 0x291   : > { %v1565_v61 = vsel %vm1563_vm13, %v1558_v21, %v1560_v18  ;;  %v1575_v48 = vrot.slane %v1564_v36, 6  ;;  %v1566_v5 = vsel %vm1563_vm13, %v3314_v11, %v1558_v21  ;;  %v1525_v21 = vmul.f32 %v1523_v10, %v1513_v51 }
 0x292   : > { %v1574_v37 = vrot.slane %v1565_v61, 7  ;;  %v1681_v51 = vstv %s1680_s29 }
 0x293   : > { %v1578_v57 = vsel %vm333_vm8, %v1575_v48, %v1576_v42  ;;  %v1526_v27 = vadd.f32 %v1525_v21, %v1498_v19 }
 0x294   : > { %v1577_v23 = vsel %vm259_vm2, %v1566_v5, %v1574_v37 }
 0x295   : > { %v1579_v59 = vsel %vm335_vm9, %v1577_v23, %v1578_v57 }
 0x296   : > { %v1581_v33 = vmul.f32 %v1579_v59, %v1569_v13 }
 0x297   : > { %v3317_v50 = vpop.permute.xlu1 %1585  ;;  %v1646_v2 = vpop.permute.xlu2 %1645 }
 0x298   : > { %v3322_v0 = vpop.permute.xlu0 %1583  ;;  %v1593_v49 = vsel %vm1591_vm14, %v3317_v50, %v1588_v3 }
 0x299   : > { %v1602_v14 = vrot.slane %v1593_v49, 7  ;;  %v1594_v15 = vsel %vm1591_vm14, %v3322_v0, %v3317_v50  ;;  %v1651_v50 = vsel %vm1647_vm1, %v1646_v2, %v3350_v31 }
 0x29a   : > { %v1660_v4 = vrot.slane %v1651_v50, 5 }
 0x29b   : > { %v1605_v60 = vsel %vm259_vm2, %v1594_v15, %v1602_v14 }
 0x29f   : > { %v1612_v32 = vpop.permute.xlu1 %1611 }
 0x2a0   : > { %v1590_v8 = vpop.permute.xlu0 %1589  ;;  %v1622_v16 = vsel %vm1619_vm15, %v1612_v32, %v3319_v22 }
 0x2a1   : > { %v1592_v47 = vsel %vm1591_vm14, %v1588_v3, %v1590_v8  ;;  %v1595_v38 = vsel %vm1591_vm14, %v1590_v8, %v3322_v0  ;;  %v1551_v3 = vsel %vm335_vm9, %v1549_v40, %v1550_v53 }
 0x2a2   : > { %v1603_v46 = vrot.slane %v1592_v47, 6  ;;  %v1604_v58 = vrot.slane %v1595_v38, 5  ;;  %v1553_v20 = vmul.f32 %v1551_v3, %v1541_v45  ;;  %v1653_v47 = vld [vmem:[#allocation5 + $0xc0] ss:$8 sm:$0xf] }
 0x2a4   : > { %v1606_v28 = vsel %vm333_vm8, %v1603_v46, %v1604_v58  ;;  %v1554_v34 = vadd.f32 %v1553_v20, %v1526_v27 }
 0x2a5   : > { %v1607_v9 = vsel %vm335_vm9, %v1605_v60, %v1606_v28 }
 0x2a6   : > { %v1609_v63 = vmul.f32 %v1607_v9, %v1597_v6  ;;  %v1582_v52 = vadd.f32 %v1581_v33, %v1554_v34 }
 0x2a7   : > { %v1618_v43 = vpop.permute.xlu1 %1617 }
 0x2a8   : > { %v1623_v44 = vsel %vm1619_vm15, %v1618_v43, %v1612_v32  ;;  %v1616_v17 = vpop.permute.xlu0 %1615  ;;  %v1610_v35 = vadd.f32 %v1609_v63, %v1582_v52 }
 0x2a9   : > { %v1632_v18 = vrot.slane %v1623_v44, 5  ;;  %v1620_v25 = vsel %vm1619_vm15, %v1616_v17, %v1618_v43  ;;  %v1621_v11 = vsel %vm1619_vm15, %v3319_v22, %v1616_v17  ;;  %v1625_v22 = vld [vmem:[#allocation5 + $0xa7] ss:$8 sm:$0xf] }
 0x2aa   : > { %v1630_v12 = vrot.slane %v1621_v11, 7  ;;  %v1631_v62 = vrot.slane %v1620_v25, 6 }
 0x2ac   : > { %v1633_v56 = vsel %vm259_vm2, %v1622_v16, %v1630_v12  ;;  %v1634_v55 = vsel %vm333_vm8, %v1631_v62, %v1632_v18 }
 0x2ad   : > { %v1635_v0 = vsel %vm335_vm9, %v1633_v56, %v1634_v55 }
 0x2ae   : > { %v1637_v30 = vmul.f32 %v1635_v0, %v1625_v22 }
 0x2af   : > { %v1644_v32 = vpop.permute.xlu1 %1643 }
 0x2b0   : > { %v1648_v8 = vsel %vm1647_vm1, %v1644_v32, %v1646_v2  ;;  %v1642_v54 = vpop.permute.xlu0 %1641  ;;  %v1638_v37 = vadd.f32 %v1637_v30, %v1610_v35 }
 0x2b1   : > { %v1659_v36 = vrot.slane %v1648_v8, 6  ;;  %v1649_v61 = vsel %vm1647_vm1, %v1642_v54, %v1644_v32  ;;  %v1650_v38 = vsel %vm1647_vm1, %v3350_v31, %v1642_v54 }
 0x2b2   : > { %v1658_v39 = vrot.slane %v1649_v61, 7 }
 0x2b3   : > { %v1662_v29 = vsel %vm333_vm8, %v1659_v36, %v1660_v4 }
 0x2b4   : > { %v1661_v41 = vsel %vm259_vm2, %v1650_v38, %v1658_v39 }
 0x2b5   : > { %v1663_v48 = vsel %vm335_vm9, %v1661_v41, %v1662_v29 }
 0x2b6   : > { %v1665_v7 = vmul.f32 %v1663_v48, %v1653_v47 }
 0x2b8   : > { %v1666_v26 = vadd.f32 %v1665_v7, %v1638_v37 }
 0x2ba   : > { %v1668_v42 = vperm.slane %v1666_v26, 0  ;;  %v1669_v49 = vperm.slane %v1666_v26, 1  ;;  %v1671_v40 = vperm.slane %v1666_v26, 3  ;;  %v1670_v53 = vperm.slane %v1666_v26, 2 }
 0x2bc   : > { %v1672_v46 = vrot.slane %v1671_v40, 7  ;;  %v1673_v58 = vrot.slane %v1668_v42, 6  ;;  %v1674_v19 = vrot.slane %v1669_v49, 5 }
 0x2be   : > { %v1675_v24 = vsel %vm259_vm2, %v1670_v53, %v1672_v46  ;;  %v1676_v31 = vsel %vm333_vm8, %v1673_v58, %v1674_v19 }
 0x2bf   : > { %v1677_v10 = vsel %vm335_vm9, %v1675_v24, %v1676_v31 }
 0x2c0   : > { %v1679_v5 = vadd.f32 %v1677_v10, %v1666_v26 }
 0x2c2   : > { %v1682_v43 = vadd.f32 %v1681_v51, %v1679_v5 }
 0x2c4   : > { %v1824_v57 = vmul.f32 -1.442695, %v1682_v43 }
 0x2c6   : > { %1955 = vpow2.f32 %v1824_v57 }
 0x2cc   : > { %v1956_v23 = vpop.eup %1955 }
 0x2cd   : > { %v1686_v14 = vadd.f32 1.0, %v1956_v23 }
 0x2cf   : > { %1957 = vrcp.f32 %v1686_v14  ;;  %v1698_v3 = vand.u32 2147483648, %v1686_v14  ;;  %v1696_v25 = vand.u32 2147483647, %v1686_v14  ;;  %vm1692_vm8 = vweird.f32 %v1686_v14 }
 0x2d1   : > { %v1699_v21 = vor.u32 1.1754944e-38, %v1698_v3  ;;  %vm1697_vm3 = vcmp.eq.f32.partialorder %v1696_v25, 8.507059e+37 }
 0x2d5   : > { %v1958_v44 = vpop.eup %1957 }
 0x2d6   : > { %v1688_v17 = vmul.f32 %v1958_v44, %v1686_v14  ;;  %vm1693_vm2 = vweird.f32 %v1958_v44 }
 0x2d7   : > { %vm1694_vm9 = vmor %vm1692_vm8, %vm1693_vm2 }
 0x2d8   : > { %v1689_v45 = vsub.f32 1.0, %v1688_v17 }
 0x2da   : > { %v1690_v18 = vmul.f32 %v1958_v44, %v1689_v45 }
 0x2dc   : > { %v1691_v11 = vadd.f32 %v1958_v44, %v1690_v18 }
 0x2de   : > { %v1695_v28 = vsel %vm1694_vm9, %v1958_v44, %v1691_v11 }
 0x2df   : > { %v1700_v12 = vsel %vm1697_vm3, %v1699_v21, %v1695_v28 }
 0x2e0   : > { %1702 = vst.msk [vmem:[%s222_s7] sm:$0x3] %vm2289_vm0, %v1700_v12 }
 0x2e1   : > { %2046 = shalt.err (!%p2043_p13)
}
 0x2e2   : > { %1836 = dma.vmem_to_hbm [thread:$0]  (%p2254_p4), %s1717_s11, 32, %s1719_s12, %s1704_s17  }
 0x2e3 PF: > { %s1730_s28 = sand.u32 1, %s2085_s14   ;;  %p1847_p0 = pnand %p1816_p6, %p2262_p7 }
 0x2e4   : > { %s1731_s27 = scalar_lea.sflag [#allocation7], %s1730_s28 }
 0x2e5   : > { %p1848_p2 = pneg %p1847_p0 }
 0x2e7   : > { %2080 = dma.done.wait (%p1848_p2), %s1731_s27, 32  }
 0x2e8   : > { %2082 = vsyncadd (%p1848_p2), %s1731_s27, 4294967264  ;;  %s21_s19 = sadd.s32 1, %s2105_s19   ;;  %s3469_s14 = smov %s2089_s15 }
 0x2e9   : > { %p18_p5 = scmp.ge.s32.totalorder %s21_s19, 4   ;;  %s3470_s15 = smov %s2093_s16 }
 0x2ea   : > { %s3471_s16 = smov %s2260_s9  ;;  %s3472_s17 = smov %s2101_s18 }
 0x2eb   : > { %s3473_s18 = smov %s3475_s30  ;;  %20 = sbr.rel (!%p18_p5) target bundleno = 9 (0x9), region = 138 }
 0x2f0   :  { %1737 = vsyncpa [#allocation6], 1 }
 0x2f1   :  { %1739 = vsyncpa [#allocation6 + $0x1], 1 }
 0x2f2   :  { %1740 = vsyncpa [#allocation9], 1 }
 0x2f3   :  { %1742 = vsyncpa [#allocation9 + $0x1], 1 }
 0x2f4   :  { %1743 = vsyncpa [#allocation7], 1 }
 0x2f5   :  { %1745 = vsyncpa [#allocation7 + $0x1], 1 }

</bundles_post_ra>
